<compile_context>
chip_gen: v6e
topology: v6e:2x2x1
jax: 0.10.0
libtpu: 0.0.40
codegen_flags: <defaults>
</compile_context>

<pallas_src>
import jax
import jax.numpy as jnp
from jax.experimental import pallas as pl
from jax.experimental.pallas import tpu as pltpu


# ----------------------------------------------------------------------------
# The fused kernel
# ----------------------------------------------------------------------------
def _lenet5_kernel(xe_ref, xo_ref, t1e_ref, t1o_ref, t2e_ref, t2o_ref,
                   w1_ref, wf2_ref, wf3_ref, b_ref, out_ref):
    f32 = jnp.float32
    tb = out_ref.shape[0]
    mmdt = t1e_ref.dtype

    def mm(a, w):
        # MXU matmul, f32 accumulation; operands in the (pre-cast) weight dtype.
        return jnp.dot(a.astype(w.dtype), w, preferred_element_type=f32)

    biases = b_ref[...]                                       # (5, 128) f32
    b1 = biases[0:1, 0:72]
    b2 = biases[1:2, 0:64]
    bf1 = biases[2:3, 0:64]
    bf2 = biases[3:4, 0:32]
    bf3 = biases[4:5, :]                                      # (1, 128)

    # ---- conv1 + pool1: four stacked MXU matmuls, K = 5*28 = 140.
    # xe/xo rows = (batch, pooled_row) for even/odd conv1 output rows;
    # T1e/T1o produce even/odd conv1 output columns, so the whole 2x2 max-pool
    # is a plain elementwise max of the four matmul results.
    xe = xe_ref[...]                                          # (tb*12, 140)
    xo = xo_ref[...]
    t1e = t1e_ref[...]                                        # (140, 72)
    t1o = t1o_ref[...]
    m1 = jnp.maximum(jnp.maximum(mm(xe, t1e), mm(xe, t1o)),
                     jnp.maximum(mm(xo, t1e), mm(xo, t1o)))   # (tb*12, 72)
    p1 = jnp.maximum(m1 + b1, 0.0).astype(mmdt)               # lanes = w*6 + cin
    p1 = p1.reshape(tb, 12, 72)

    # ---- conv2 + pool2 (W): stack all 8 output rows -> one (tb*8,72)x(72,64)
    # matmul per tap kh and W-parity (10 MXU issues total).
    acc_e = None
    acc_o = None
    for kh in range(5):
        a = p1[:, kh:kh + 8, :].reshape(tb * 8, 72)
        de = mm(a, t2e_ref[kh])                               # (tb*8, 64)
        do = mm(a, t2o_ref[kh])
        acc_e = de if acc_e is None else acc_e + de
        acc_o = do if acc_o is None else acc_o + do
    wm2 = jnp.maximum(acc_e, acc_o).reshape(tb, 8, 64)        # W-pooled, lanes = w*16+c

    # ---- pool2 (H) + bias + ReLU, then fc1 as 4 accumulated matmuls
    # (the torch flatten is folded into the per-row fc1 weight blocks).
    acc = None
    for h in range(4):
        p2h = jnp.maximum(jnp.max(wm2[:, 2 * h:2 * h + 2, :], axis=1) + b2, 0.0)
        d = mm(p2h, w1_ref[h])                                # (tb, 64)
        acc = d if acc is None else acc + d
    y1 = jnp.maximum(acc + bf1, 0.0)                          # (tb, 64)
    y2 = jnp.maximum(mm(y1, wf2_ref[...]) + bf2, 0.0)         # (tb, 32)
    y3 = mm(y2, wf3_ref[...]) + bf3                           # (tb, 128) lane-dense
    out_ref[...] = y3.astype(out_ref.dtype)


# ----------------------------------------------------------------------------
# One-time weight preparation (transpose / permute / Toeplitz-ify / cast)
# ----------------------------------------------------------------------------
def prepare_params(p, *, mm_dtype=jnp.bfloat16):
    """Convert torch-layout LeNet5 params into kernel-friendly matrices (once)."""
    K = 5
    w1 = p["conv1_w"]          # (6, 1, 5, 5)
    w2 = p["conv2_w"]          # (16, 6, 5, 5)

    # conv1: (140, 72) matrix per output-column parity; row = kh*28 + w_in,
    # col = w_out*6 + c (w_out = pooled W index 0..11).
    win = jnp.arange(28)[:, None]
    t_out = jnp.arange(12)[None, :]
    w1t = jnp.transpose(w1[:, 0, :, :], (1, 2, 0))            # (kh, kw, c)

    def conv1_toeplitz(offset):
        kw = win - (2 * t_out + offset)                       # (28, 12)
        valid = (kw >= 0) & (kw < K)
        kw_c = jnp.clip(kw, 0, K - 1)
        tmat = w1t[:, kw_c, :] * valid[None, :, :, None]      # (5, 28, 12, 6)
        return tmat.reshape(140, 72)

    # conv2: (72, 64) per tap kh and parity; row = w_in*6 + cin, col = w_out*16 + cout.
    t_in = jnp.arange(12)[:, None]
    wo = jnp.arange(4)[None, :]
    w2t = jnp.transpose(w2, (2, 3, 1, 0))                     # (kh, kw, cin, cout)

    def conv2_toeplitz(offset):
        kw = t_in - (2 * wo + offset)                         # (12, 4)
        valid = (kw >= 0) & (kw < K)
        kw_c = jnp.clip(kw, 0, K - 1)
        tmat = w2t[:, kw_c, :, :] * valid[None, :, :, None, None]  # (5,12,4,6,16)
        tmat = jnp.transpose(tmat, (0, 1, 3, 2, 4))           # (5, 12, 6, 4, 16)
        return tmat.reshape(5, 72, 64)

    # fc1: torch flatten index q = c*16 + h*4 + w; kernel feeds 4 rows (h) with
    # lanes w*16 + c, so re-block fc1_w accordingly.
    wf1 = p["fc1_w"].reshape(64, 16, 4, 4)                    # (n, c, h, w)
    w1h = jnp.transpose(wf1, (2, 3, 1, 0)).reshape(4, 64, 64)  # (h, w*16+c, n)

    # fc3 padded to 128 output lanes (lane-dense stores; extra lanes are 0).
    wf3 = jnp.zeros((32, 128), jnp.float32).at[:, :10].set(p["fc3_w"].T)

    # All bias vectors packed into one (5, 128) f32 array (kept f32; added to
    # f32 accumulators).
    biases = jnp.zeros((5, 128), jnp.float32)
    biases = biases.at[0, :72].set(jnp.tile(p["conv1_b"], 12))
    biases = biases.at[1, :64].set(jnp.tile(p["conv2_b"], 4))
    biases = biases.at[2, :64].set(p["fc1_b"])
    biases = biases.at[3, :32].set(p["fc2_b"])
    biases = biases.at[4, :10].set(p["fc3_b"])

    return {
        "T1e": conv1_toeplitz(0).astype(mm_dtype),
        "T1o": conv1_toeplitz(1).astype(mm_dtype),
        "T2e": conv2_toeplitz(0).astype(mm_dtype),
        "T2o": conv2_toeplitz(1).astype(mm_dtype),
        "W1h": w1h.astype(mm_dtype),
        "Wf2": p["fc2_w"].T.astype(mm_dtype),                 # (64, 32)
        "Wf3": wf3.astype(mm_dtype),                          # (32, 128)
        "B": biases,                                          # (5, 128) f32
    }


# ----------------------------------------------------------------------------
# Forward wrapper
# ----------------------------------------------------------------------------
def _round_up(v, m):
    return ((v + m - 1) // m) * m


def lenet5_forward(kp, x, *, block_b=256):
    """x: (B, 1, 28, 28) float32 NCHW -> logits (B, 10) float32."""
    B = x.shape[0]
    mmdt = kp["T1e"].dtype
    x3 = x.reshape(B, 28, 28).astype(jnp.float32)

    # Batch tile: large for MXU row occupancy; >=2 grid steps whenever the
    # batch allows it (v7x megacore has 2 TensorCores).
    if B <= 16:
        TB, Bp = B, B                                 # tiny batch: single step
    elif B <= block_b:
        TB = _round_up(pl.cdiv(B, 2), 8)              # exactly 2 parallel steps
        Bp = 2 * TB
    else:
        TB = block_b
        Bp = pl.cdiv(B, TB) * TB
    if Bp != B:
        x3 = jnp.pad(x3, ((0, Bp - B), (0, 0), (0, 0)))

    # H-only im2col (lane-dense, K = 5*28 = 140) split by conv1 output-row
    # parity, so the 2x2 pool is a pure elementwise max inside the kernel.
    xe = jnp.stack([x3[:, kh:kh + 24:2, :] for kh in range(5)], axis=2)
    xo = jnp.stack([x3[:, kh + 1:kh + 25:2, :] for kh in range(5)], axis=2)
    xe = xe.reshape(Bp * 12, 140).astype(mmdt)        # lane = kh*28 + w
    xo = xo.reshape(Bp * 12, 140).astype(mmdt)

    weights = (kp["T1e"], kp["T1o"], kp["T2e"], kp["T2o"],
               kp["W1h"], kp["Wf2"], kp["Wf3"], kp["B"])

    def const_spec(shape):
        nd = len(shape)
        return pl.BlockSpec(shape, lambda i, _nd=nd: (0,) * _nd)

    in_specs = [pl.BlockSpec((TB * 12, 140), lambda i: (i, 0)),
                pl.BlockSpec((TB * 12, 140), lambda i: (i, 0))]
    in_specs += [const_spec(w.shape) for w in weights]

    out = pl.pallas_call(
        _lenet5_kernel,
        out_shape=jax.ShapeDtypeStruct((Bp, 128), jnp.float32),
        grid=(Bp // TB,),
        in_specs=in_specs,
        out_specs=pl.BlockSpec((TB, 128), lambda i: (i, 0)),
        compiler_params=pltpu.CompilerParams(
            dimension_semantics=("parallel",),
            vmem_limit_bytes=48 * 1024 * 1024),
    )(xe, xo, *weights)
    return out[:B, :10]


# ----------------------------------------------------------------------------
# Torch-equivalent init + plain-JAX reference (numerical sanity check)
# ----------------------------------------------------------------------------
def init_params(key):
    def uniform(k, shape, fan_in):
        bound = 1.0 / jnp.sqrt(jnp.float32(fan_in))
        return jax.random.uniform(k, shape, jnp.float32, -bound, bound)

    ks = jax.random.split(key, 10)
    return {
        "conv1_w": uniform(ks[0], (6, 1, 5, 5), 1 * 5 * 5),
        "conv1_b": uniform(ks[1], (6,), 1 * 5 * 5),
        "conv2_w": uniform(ks[2], (16, 6, 5, 5), 6 * 5 * 5),
        "conv2_b": uniform(ks[3], (16,), 6 * 5 * 5),
        "fc1_w": uniform(ks[4], (64, 256), 256),
        "fc1_b": uniform(ks[5], (64,), 256),
        "fc2_w": uniform(ks[6], (32, 64), 64),
        "fc2_b": uniform(ks[7], (64,), 64)[:32],
        "fc3_w": uniform(ks[8], (10, 32), 32),
        "fc3_b": uniform(ks[9], (10,), 32),
    }


def lenet5_reference(params, x, mm_dtype=jnp.float32):
    """Plain-JAX LeNet5 whose matmul operands are cast to mm_dtype (f32 accum),
    numerically matching the kernel run with the same mm_dtype."""
    f32 = jnp.float32
    prec = jax.lax.Precision.HIGHEST if mm_dtype == jnp.float32 else None

    def conv(t, w, b):
        y = jax.lax.conv_general_dilated(
            t.astype(mm_dtype), w.astype(mm_dtype), window_strides=(1, 1),
            padding="VALID", dimension_numbers=("NCHW", "OIHW", "NCHW"),
            precision=prec, preferred_element_type=f32)
        return jax.nn.relu(y + b[None, :, None, None])

    def pool(t):
        n, c, h, w = t.shape
        return t.reshape(n, c, h // 2, 2, w // 2, 2).max(axis=(3, 5))

    def dense(t, w, b):
        return jnp.dot(t.astype(mm_dtype), w.T.astype(mm_dtype),
                       precision=prec, preferred_element_type=f32) + b

    t = pool(conv(x.astype(f32), params["conv1_w"], params["conv1_b"]))
    t = pool(conv(t, params["conv2_w"], params["conv2_b"]))
    t = t.reshape(t.shape[0], 256)
    t = jax.nn.relu(dense(t, params["fc1_w"], params["fc1_b"]))
    t = jax.nn.relu(dense(t, params["fc2_w"], params["fc2_b"]))
    return dense(t, params["fc3_w"], params["fc3_b"])


if __name__ == "__main__":
    key = jax.random.PRNGKey(0)
    pkey, xkey = jax.random.split(key)
    params = init_params(pkey)
    x = jax.random.normal(xkey, (2, 1, 28, 28), jnp.float32)

    # Default deployment path: bf16 MXU operands (v5e/v6e/v7x native), f32 accum.
    kp_bf16 = prepare_params(params, mm_dtype=jnp.bfloat16)
    out = jax.block_until_ready(jax.jit(lenet5_forward)(kp_bf16, x))
    assert out.shape == (2, 10) and out.dtype == jnp.float32
    err_bf16 = float(jnp.max(jnp.abs(out - lenet5_reference(params, x, jnp.bfloat16))))
    assert err_bf16 < 1e-2, f"bf16 max abs err {err_bf16}"

    # f32-operand path: strict structural check against the full-precision
    # PyTorch-equivalent reference.
    kp_f32 = prepare_params(params, mm_dtype=jnp.float32)
    out32 = jax.block_until_ready(jax.jit(lenet5_forward)(kp_f32, x))
    err_f32 = float(jnp.max(jnp.abs(out32 - lenet5_reference(params, x, jnp.float32))))
    assert err_f32 < 2e-2, f"f32 max abs err {err_f32}"

    print("KERNEL_OK")
</pallas_src>

<mosaic_0001>
module attributes {stable_mosaic.version = 11 : i64} {
  func.func @_lenet5_kernel(%arg0: i32, %arg1: memref<24x140xbf16, #tpu.memory_space<vmem>>, %arg2: memref<24x140xbf16, #tpu.memory_space<vmem>>, %arg3: memref<140x72xbf16, #tpu.memory_space<vmem>>, %arg4: memref<140x72xbf16, #tpu.memory_space<vmem>>, %arg5: memref<5x72x64xbf16, #tpu.memory_space<vmem>>, %arg6: memref<5x72x64xbf16, #tpu.memory_space<vmem>>, %arg7: memref<4x64x64xbf16, #tpu.memory_space<vmem>>, %arg8: memref<64x32xbf16, #tpu.memory_space<vmem>>, %arg9: memref<32x128xbf16, #tpu.memory_space<vmem>>, %arg10: memref<5x128xf32, #tpu.memory_space<vmem>>, %arg11: memref<2x128xf32, #tpu.memory_space<vmem>>) attributes {dimension_semantics = [#tpu.dimension_semantics<parallel>], iteration_bounds = array<i64: 1>, scalar_prefetch = 0 : i64, scratch_operands = 0 : i64, tpu.core_type = #tpu.core_type<tc>, window_params = [{transform_indices = @transform_0, window_bounds = array<i64: 24, 140>}, {transform_indices = @transform_1, window_bounds = array<i64: 24, 140>}, {pipeline_mode = #tpu.pipeline_mode<synchronous>, transform_indices = @transform_2, window_bounds = array<i64: 140, 72>}, {pipeline_mode = #tpu.pipeline_mode<synchronous>, transform_indices = @transform_3, window_bounds = array<i64: 140, 72>}, {pipeline_mode = #tpu.pipeline_mode<synchronous>, transform_indices = @transform_4, window_bounds = array<i64: 5, 72, 64>}, {pipeline_mode = #tpu.pipeline_mode<synchronous>, transform_indices = @transform_5, window_bounds = array<i64: 5, 72, 64>}, {pipeline_mode = #tpu.pipeline_mode<synchronous>, transform_indices = @transform_6, window_bounds = array<i64: 4, 64, 64>}, {pipeline_mode = #tpu.pipeline_mode<synchronous>, transform_indices = @transform_7, window_bounds = array<i64: 64, 32>}, {pipeline_mode = #tpu.pipeline_mode<synchronous>, transform_indices = @transform_8, window_bounds = array<i64: 32, 128>}, {pipeline_mode = #tpu.pipeline_mode<synchronous>, transform_indices = @transform_9, window_bounds = array<i64: 5, 128>}, {transform_indices = @transform_10, window_bounds = array<i64: 2, 128>}]} {
    %c0 = arith.constant 0 : index
    %c0_0 = arith.constant 0 : index
    %0 = vector.load %arg10[%c0, %c0_0] : memref<5x128xf32, #tpu.memory_space<vmem>>, vector<5x128xf32>
    %1 = vector.extract_strided_slice %0 {offsets = [0, 0], sizes = [1, 72], strides = [1, 1]} : vector<5x128xf32> to vector<1x72xf32>
    %2 = vector.extract_strided_slice %0 {offsets = [1, 0], sizes = [1, 64], strides = [1, 1]} : vector<5x128xf32> to vector<1x64xf32>
    %3 = vector.extract_strided_slice %0 {offsets = [2, 0], sizes = [1, 64], strides = [1, 1]} : vector<5x128xf32> to vector<1x64xf32>
    %4 = vector.extract_strided_slice %0 {offsets = [3, 0], sizes = [1, 32], strides = [1, 1]} : vector<5x128xf32> to vector<1x32xf32>
    %5 = vector.extract_strided_slice %0 {offsets = [4, 0], sizes = [1, 128], strides = [1, 1]} : vector<5x128xf32> to vector<1x128xf32>
    %c0_1 = arith.constant 0 : index
    %c0_2 = arith.constant 0 : index
    %6 = vector.load %arg1[%c0_1, %c0_2] : memref<24x140xbf16, #tpu.memory_space<vmem>>, vector<24x140xbf16>
    %c0_3 = arith.constant 0 : index
    %c0_4 = arith.constant 0 : index
    %7 = vector.load %arg2[%c0_3, %c0_4] : memref<24x140xbf16, #tpu.memory_space<vmem>>, vector<24x140xbf16>
    %c0_5 = arith.constant 0 : index
    %c0_6 = arith.constant 0 : index
    %8 = vector.load %arg3[%c0_5, %c0_6] : memref<140x72xbf16, #tpu.memory_space<vmem>>, vector<140x72xbf16>
    %c0_7 = arith.constant 0 : index
    %c0_8 = arith.constant 0 : index
    %9 = vector.load %arg4[%c0_7, %c0_8] : memref<140x72xbf16, #tpu.memory_space<vmem>>, vector<140x72xbf16>
    %cst = arith.constant dense<0.000000e+00> : vector<24x72xf32>
    %10 = tpu.matmul %6, %8, %cst {dimension_numbers = #tpu.dot_dimension_numbers<[1], [0], [0], [1], [0, 0, 1, 1], [], []>} : vector<24x140xbf16>, vector<140x72xbf16>, vector<24x72xf32> -> vector<24x72xf32>
    %cst_9 = arith.constant dense<0.000000e+00> : vector<24x72xf32>
    %11 = tpu.matmul %6, %9, %cst_9 {dimension_numbers = #tpu.dot_dimension_numbers<[1], [0], [0], [1], [0, 0, 1, 1], [], []>} : vector<24x140xbf16>, vector<140x72xbf16>, vector<24x72xf32> -> vector<24x72xf32>
    %12 = arith.maximumf %10, %11 : vector<24x72xf32>
    %cst_10 = arith.constant dense<0.000000e+00> : vector<24x72xf32>
    %13 = tpu.matmul %7, %8, %cst_10 {dimension_numbers = #tpu.dot_dimension_numbers<[1], [0], [0], [1], [0, 0, 1, 1], [], []>} : vector<24x140xbf16>, vector<140x72xbf16>, vector<24x72xf32> -> vector<24x72xf32>
    %cst_11 = arith.constant dense<0.000000e+00> : vector<24x72xf32>
    %14 = tpu.matmul %7, %9, %cst_11 {dimension_numbers = #tpu.dot_dimension_numbers<[1], [0], [0], [1], [0, 0, 1, 1], [], []>} : vector<24x140xbf16>, vector<140x72xbf16>, vector<24x72xf32> -> vector<24x72xf32>
    %15 = arith.maximumf %13, %14 : vector<24x72xf32>
    %16 = arith.maximumf %12, %15 : vector<24x72xf32>
    %17 = vector.broadcast %1 : vector<1x72xf32> to vector<24x72xf32>
    %18 = arith.addf %16, %17 : vector<24x72xf32>
    %cst_12 = arith.constant 0.000000e+00 : f32
    %19 = vector.broadcast %cst_12 : f32 to vector<24x72xf32>
    %20 = arith.maximumf %18, %19 : vector<24x72xf32>
    %21 = arith.truncf %20 : vector<24x72xf32> to vector<24x72xbf16>
    %22 = vector.shape_cast %21 : vector<24x72xbf16> to vector<2x12x72xbf16>
    %23 = vector.extract_strided_slice %22 {offsets = [0, 0, 0], sizes = [2, 8, 72], strides = [1, 1, 1]} : vector<2x12x72xbf16> to vector<2x8x72xbf16>
    %24 = vector.shape_cast %23 : vector<2x8x72xbf16> to vector<16x72xbf16>
    %c0_13 = arith.constant 0 : index
    %c0_14 = arith.constant 0 : index
    %c0_15 = arith.constant 0 : index
    %25 = vector.load %arg5[%c0_13, %c0_14, %c0_15] : memref<5x72x64xbf16, #tpu.memory_space<vmem>>, vector<1x72x64xbf16>
    %26 = vector.shape_cast %25 : vector<1x72x64xbf16> to vector<72x64xbf16>
    %cst_16 = arith.constant dense<0.000000e+00> : vector<16x64xf32>
    %27 = tpu.matmul %24, %26, %cst_16 {dimension_numbers = #tpu.dot_dimension_numbers<[1], [0], [0], [1], [0, 0, 1, 1], [], []>} : vector<16x72xbf16>, vector<72x64xbf16>, vector<16x64xf32> -> vector<16x64xf32>
    %c0_17 = arith.constant 0 : index
    %c0_18 = arith.constant 0 : index
    %c0_19 = arith.constant 0 : index
    %28 = vector.load %arg6[%c0_17, %c0_18, %c0_19] : memref<5x72x64xbf16, #tpu.memory_space<vmem>>, vector<1x72x64xbf16>
    %29 = vector.shape_cast %28 : vector<1x72x64xbf16> to vector<72x64xbf16>
    %cst_20 = arith.constant dense<0.000000e+00> : vector<16x64xf32>
    %30 = tpu.matmul %24, %29, %cst_20 {dimension_numbers = #tpu.dot_dimension_numbers<[1], [0], [0], [1], [0, 0, 1, 1], [], []>} : vector<16x72xbf16>, vector<72x64xbf16>, vector<16x64xf32> -> vector<16x64xf32>
    %31 = vector.extract_strided_slice %22 {offsets = [0, 1, 0], sizes = [2, 8, 72], strides = [1, 1, 1]} : vector<2x12x72xbf16> to vector<2x8x72xbf16>
    %32 = vector.shape_cast %31 : vector<2x8x72xbf16> to vector<16x72xbf16>
    %c1 = arith.constant 1 : index
    %c0_21 = arith.constant 0 : index
    %c0_22 = arith.constant 0 : index
    %33 = vector.load %arg5[%c1, %c0_21, %c0_22] : memref<5x72x64xbf16, #tpu.memory_space<vmem>>, vector<1x72x64xbf16>
    %34 = vector.shape_cast %33 : vector<1x72x64xbf16> to vector<72x64xbf16>
    %cst_23 = arith.constant dense<0.000000e+00> : vector<16x64xf32>
    %35 = tpu.matmul %32, %34, %cst_23 {dimension_numbers = #tpu.dot_dimension_numbers<[1], [0], [0], [1], [0, 0, 1, 1], [], []>} : vector<16x72xbf16>, vector<72x64xbf16>, vector<16x64xf32> -> vector<16x64xf32>
    %c1_24 = arith.constant 1 : index
    %c0_25 = arith.constant 0 : index
    %c0_26 = arith.constant 0 : index
    %36 = vector.load %arg6[%c1_24, %c0_25, %c0_26] : memref<5x72x64xbf16, #tpu.memory_space<vmem>>, vector<1x72x64xbf16>
    %37 = vector.shape_cast %36 : vector<1x72x64xbf16> to vector<72x64xbf16>
    %cst_27 = arith.constant dense<0.000000e+00> : vector<16x64xf32>
    %38 = tpu.matmul %32, %37, %cst_27 {dimension_numbers = #tpu.dot_dimension_numbers<[1], [0], [0], [1], [0, 0, 1, 1], [], []>} : vector<16x72xbf16>, vector<72x64xbf16>, vector<16x64xf32> -> vector<16x64xf32>
    %39 = arith.addf %27, %35 : vector<16x64xf32>
    %40 = arith.addf %30, %38 : vector<16x64xf32>
    %41 = vector.extract_strided_slice %22 {offsets = [0, 2, 0], sizes = [2, 8, 72], strides = [1, 1, 1]} : vector<2x12x72xbf16> to vector<2x8x72xbf16>
    %42 = vector.shape_cast %41 : vector<2x8x72xbf16> to vector<16x72xbf16>
    %c2 = arith.constant 2 : index
    %c0_28 = arith.constant 0 : index
    %c0_29 = arith.constant 0 : index
    %43 = vector.load %arg5[%c2, %c0_28, %c0_29] : memref<5x72x64xbf16, #tpu.memory_space<vmem>>, vector<1x72x64xbf16>
    %44 = vector.shape_cast %43 : vector<1x72x64xbf16> to vector<72x64xbf16>
    %cst_30 = arith.constant dense<0.000000e+00> : vector<16x64xf32>
    %45 = tpu.matmul %42, %44, %cst_30 {dimension_numbers = #tpu.dot_dimension_numbers<[1], [0], [0], [1], [0, 0, 1, 1], [], []>} : vector<16x72xbf16>, vector<72x64xbf16>, vector<16x64xf32> -> vector<16x64xf32>
    %c2_31 = arith.constant 2 : index
    %c0_32 = arith.constant 0 : index
    %c0_33 = arith.constant 0 : index
    %46 = vector.load %arg6[%c2_31, %c0_32, %c0_33] : memref<5x72x64xbf16, #tpu.memory_space<vmem>>, vector<1x72x64xbf16>
    %47 = vector.shape_cast %46 : vector<1x72x64xbf16> to vector<72x64xbf16>
    %cst_34 = arith.constant dense<0.000000e+00> : vector<16x64xf32>
    %48 = tpu.matmul %42, %47, %cst_34 {dimension_numbers = #tpu.dot_dimension_numbers<[1], [0], [0], [1], [0, 0, 1, 1], [], []>} : vector<16x72xbf16>, vector<72x64xbf16>, vector<16x64xf32> -> vector<16x64xf32>
    %49 = arith.addf %39, %45 : vector<16x64xf32>
    %50 = arith.addf %40, %48 : vector<16x64xf32>
    %51 = vector.extract_strided_slice %22 {offsets = [0, 3, 0], sizes = [2, 8, 72], strides = [1, 1, 1]} : vector<2x12x72xbf16> to vector<2x8x72xbf16>
    %52 = vector.shape_cast %51 : vector<2x8x72xbf16> to vector<16x72xbf16>
    %c3 = arith.constant 3 : index
    %c0_35 = arith.constant 0 : index
    %c0_36 = arith.constant 0 : index
    %53 = vector.load %arg5[%c3, %c0_35, %c0_36] : memref<5x72x64xbf16, #tpu.memory_space<vmem>>, vector<1x72x64xbf16>
    %54 = vector.shape_cast %53 : vector<1x72x64xbf16> to vector<72x64xbf16>
    %cst_37 = arith.constant dense<0.000000e+00> : vector<16x64xf32>
    %55 = tpu.matmul %52, %54, %cst_37 {dimension_numbers = #tpu.dot_dimension_numbers<[1], [0], [0], [1], [0, 0, 1, 1], [], []>} : vector<16x72xbf16>, vector<72x64xbf16>, vector<16x64xf32> -> vector<16x64xf32>
    %c3_38 = arith.constant 3 : index
    %c0_39 = arith.constant 0 : index
    %c0_40 = arith.constant 0 : index
    %56 = vector.load %arg6[%c3_38, %c0_39, %c0_40] : memref<5x72x64xbf16, #tpu.memory_space<vmem>>, vector<1x72x64xbf16>
    %57 = vector.shape_cast %56 : vector<1x72x64xbf16> to vector<72x64xbf16>
    %cst_41 = arith.constant dense<0.000000e+00> : vector<16x64xf32>
    %58 = tpu.matmul %52, %57, %cst_41 {dimension_numbers = #tpu.dot_dimension_numbers<[1], [0], [0], [1], [0, 0, 1, 1], [], []>} : vector<16x72xbf16>, vector<72x64xbf16>, vector<16x64xf32> -> vector<16x64xf32>
    %59 = arith.addf %49, %55 : vector<16x64xf32>
    %60 = arith.addf %50, %58 : vector<16x64xf32>
    %61 = vector.extract_strided_slice %22 {offsets = [0, 4, 0], sizes = [2, 8, 72], strides = [1, 1, 1]} : vector<2x12x72xbf16> to vector<2x8x72xbf16>
    %62 = vector.shape_cast %61 : vector<2x8x72xbf16> to vector<16x72xbf16>
    %c4 = arith.constant 4 : index
    %c0_42 = arith.constant 0 : index
    %c0_43 = arith.constant 0 : index
    %63 = vector.load %arg5[%c4, %c0_42, %c0_43] : memref<5x72x64xbf16, #tpu.memory_space<vmem>>, vector<1x72x64xbf16>
    %64 = vector.shape_cast %63 : vector<1x72x64xbf16> to vector<72x64xbf16>
    %cst_44 = arith.constant dense<0.000000e+00> : vector<16x64xf32>
    %65 = tpu.matmul %62, %64, %cst_44 {dimension_numbers = #tpu.dot_dimension_numbers<[1], [0], [0], [1], [0, 0, 1, 1], [], []>} : vector<16x72xbf16>, vector<72x64xbf16>, vector<16x64xf32> -> vector<16x64xf32>
    %c4_45 = arith.constant 4 : index
    %c0_46 = arith.constant 0 : index
    %c0_47 = arith.constant 0 : index
    %66 = vector.load %arg6[%c4_45, %c0_46, %c0_47] : memref<5x72x64xbf16, #tpu.memory_space<vmem>>, vector<1x72x64xbf16>
    %67 = vector.shape_cast %66 : vector<1x72x64xbf16> to vector<72x64xbf16>
    %cst_48 = arith.constant dense<0.000000e+00> : vector<16x64xf32>
    %68 = tpu.matmul %62, %67, %cst_48 {dimension_numbers = #tpu.dot_dimension_numbers<[1], [0], [0], [1], [0, 0, 1, 1], [], []>} : vector<16x72xbf16>, vector<72x64xbf16>, vector<16x64xf32> -> vector<16x64xf32>
    %69 = arith.addf %59, %65 : vector<16x64xf32>
    %70 = arith.addf %60, %68 : vector<16x64xf32>
    %71 = arith.maximumf %69, %70 : vector<16x64xf32>
    %72 = vector.shape_cast %71 : vector<16x64xf32> to vector<2x8x64xf32>
    %73 = vector.extract_strided_slice %72 {offsets = [0, 0, 0], sizes = [2, 2, 64], strides = [1, 1, 1]} : vector<2x8x64xf32> to vector<2x2x64xf32>
    %cst_49 = arith.constant dense<0xFF800000> : vector<2x64xf32>
    %74 = vector.multi_reduction <maximumf>, %73, %cst_49 [1] : vector<2x2x64xf32> to vector<2x64xf32>
    %75 = vector.broadcast %2 : vector<1x64xf32> to vector<2x64xf32>
    %76 = arith.addf %74, %75 : vector<2x64xf32>
    %cst_50 = arith.constant 0.000000e+00 : f32
    %77 = vector.broadcast %cst_50 : f32 to vector<2x64xf32>
    %78 = arith.maximumf %76, %77 : vector<2x64xf32>
    %c0_51 = arith.constant 0 : index
    %c0_52 = arith.constant 0 : index
    %c0_53 = arith.constant 0 : index
    %79 = vector.load %arg7[%c0_51, %c0_52, %c0_53] : memref<4x64x64xbf16, #tpu.memory_space<vmem>>, vector<1x64x64xbf16>
    %80 = vector.shape_cast %79 : vector<1x64x64xbf16> to vector<64x64xbf16>
    %81 = arith.truncf %78 : vector<2x64xf32> to vector<2x64xbf16>
    %cst_54 = arith.constant dense<0.000000e+00> : vector<2x64xf32>
    %82 = tpu.matmul %81, %80, %cst_54 {dimension_numbers = #tpu.dot_dimension_numbers<[1], [0], [0], [1], [0, 0, 1, 1], [], []>} : vector<2x64xbf16>, vector<64x64xbf16>, vector<2x64xf32> -> vector<2x64xf32>
    %83 = vector.extract_strided_slice %72 {offsets = [0, 2, 0], sizes = [2, 2, 64], strides = [1, 1, 1]} : vector<2x8x64xf32> to vector<2x2x64xf32>
    %cst_55 = arith.constant dense<0xFF800000> : vector<2x64xf32>
    %84 = vector.multi_reduction <maximumf>, %83, %cst_55 [1] : vector<2x2x64xf32> to vector<2x64xf32>
    %85 = vector.broadcast %2 : vector<1x64xf32> to vector<2x64xf32>
    %86 = arith.addf %84, %85 : vector<2x64xf32>
    %cst_56 = arith.constant 0.000000e+00 : f32
    %87 = vector.broadcast %cst_56 : f32 to vector<2x64xf32>
    %88 = arith.maximumf %86, %87 : vector<2x64xf32>
    %c1_57 = arith.constant 1 : index
    %c0_58 = arith.constant 0 : index
    %c0_59 = arith.constant 0 : index
    %89 = vector.load %arg7[%c1_57, %c0_58, %c0_59] : memref<4x64x64xbf16, #tpu.memory_space<vmem>>, vector<1x64x64xbf16>
    %90 = vector.shape_cast %89 : vector<1x64x64xbf16> to vector<64x64xbf16>
    %91 = arith.truncf %88 : vector<2x64xf32> to vector<2x64xbf16>
    %cst_60 = arith.constant dense<0.000000e+00> : vector<2x64xf32>
    %92 = tpu.matmul %91, %90, %cst_60 {dimension_numbers = #tpu.dot_dimension_numbers<[1], [0], [0], [1], [0, 0, 1, 1], [], []>} : vector<2x64xbf16>, vector<64x64xbf16>, vector<2x64xf32> -> vector<2x64xf32>
    %93 = arith.addf %82, %92 : vector<2x64xf32>
    %94 = vector.extract_strided_slice %72 {offsets = [0, 4, 0], sizes = [2, 2, 64], strides = [1, 1, 1]} : vector<2x8x64xf32> to vector<2x2x64xf32>
    %cst_61 = arith.constant dense<0xFF800000> : vector<2x64xf32>
    %95 = vector.multi_reduction <maximumf>, %94, %cst_61 [1] : vector<2x2x64xf32> to vector<2x64xf32>
    %96 = vector.broadcast %2 : vector<1x64xf32> to vector<2x64xf32>
    %97 = arith.addf %95, %96 : vector<2x64xf32>
    %cst_62 = arith.constant 0.000000e+00 : f32
    %98 = vector.broadcast %cst_62 : f32 to vector<2x64xf32>
    %99 = arith.maximumf %97, %98 : vector<2x64xf32>
    %c2_63 = arith.constant 2 : index
    %c0_64 = arith.constant 0 : index
    %c0_65 = arith.constant 0 : index
    %100 = vector.load %arg7[%c2_63, %c0_64, %c0_65] : memref<4x64x64xbf16, #tpu.memory_space<vmem>>, vector<1x64x64xbf16>
    %101 = vector.shape_cast %100 : vector<1x64x64xbf16> to vector<64x64xbf16>
    %102 = arith.truncf %99 : vector<2x64xf32> to vector<2x64xbf16>
    %cst_66 = arith.constant dense<0.000000e+00> : vector<2x64xf32>
    %103 = tpu.matmul %102, %101, %cst_66 {dimension_numbers = #tpu.dot_dimension_numbers<[1], [0], [0], [1], [0, 0, 1, 1], [], []>} : vector<2x64xbf16>, vector<64x64xbf16>, vector<2x64xf32> -> vector<2x64xf32>
    %104 = arith.addf %93, %103 : vector<2x64xf32>
    %105 = vector.extract_strided_slice %72 {offsets = [0, 6, 0], sizes = [2, 2, 64], strides = [1, 1, 1]} : vector<2x8x64xf32> to vector<2x2x64xf32>
    %cst_67 = arith.constant dense<0xFF800000> : vector<2x64xf32>
    %106 = vector.multi_reduction <maximumf>, %105, %cst_67 [1] : vector<2x2x64xf32> to vector<2x64xf32>
    %107 = vector.broadcast %2 : vector<1x64xf32> to vector<2x64xf32>
    %108 = arith.addf %106, %107 : vector<2x64xf32>
    %cst_68 = arith.constant 0.000000e+00 : f32
    %109 = vector.broadcast %cst_68 : f32 to vector<2x64xf32>
    %110 = arith.maximumf %108, %109 : vector<2x64xf32>
    %c3_69 = arith.constant 3 : index
    %c0_70 = arith.constant 0 : index
    %c0_71 = arith.constant 0 : index
    %111 = vector.load %arg7[%c3_69, %c0_70, %c0_71] : memref<4x64x64xbf16, #tpu.memory_space<vmem>>, vector<1x64x64xbf16>
    %112 = vector.shape_cast %111 : vector<1x64x64xbf16> to vector<64x64xbf16>
    %113 = arith.truncf %110 : vector<2x64xf32> to vector<2x64xbf16>
    %cst_72 = arith.constant dense<0.000000e+00> : vector<2x64xf32>
    %114 = tpu.matmul %113, %112, %cst_72 {dimension_numbers = #tpu.dot_dimension_numbers<[1], [0], [0], [1], [0, 0, 1, 1], [], []>} : vector<2x64xbf16>, vector<64x64xbf16>, vector<2x64xf32> -> vector<2x64xf32>
    %115 = arith.addf %104, %114 : vector<2x64xf32>
    %116 = vector.broadcast %3 : vector<1x64xf32> to vector<2x64xf32>
    %117 = arith.addf %115, %116 : vector<2x64xf32>
    %cst_73 = arith.constant 0.000000e+00 : f32
    %118 = vector.broadcast %cst_73 : f32 to vector<2x64xf32>
    %119 = arith.maximumf %117, %118 : vector<2x64xf32>
    %c0_74 = arith.constant 0 : index
    %c0_75 = arith.constant 0 : index
    %120 = vector.load %arg8[%c0_74, %c0_75] : memref<64x32xbf16, #tpu.memory_space<vmem>>, vector<64x32xbf16>
    %121 = arith.truncf %119 : vector<2x64xf32> to vector<2x64xbf16>
    %cst_76 = arith.constant dense<0.000000e+00> : vector<2x32xf32>
    %122 = tpu.matmul %121, %120, %cst_76 {dimension_numbers = #tpu.dot_dimension_numbers<[1], [0], [0], [1], [0, 0, 1, 1], [], []>} : vector<2x64xbf16>, vector<64x32xbf16>, vector<2x32xf32> -> vector<2x32xf32>
    %123 = vector.broadcast %4 : vector<1x32xf32> to vector<2x32xf32>
    %124 = arith.addf %122, %123 : vector<2x32xf32>
    %cst_77 = arith.constant 0.000000e+00 : f32
    %125 = vector.broadcast %cst_77 : f32 to vector<2x32xf32>
    %126 = arith.maximumf %124, %125 : vector<2x32xf32>
    %c0_78 = arith.constant 0 : index
    %c0_79 = arith.constant 0 : index
    %127 = vector.load %arg9[%c0_78, %c0_79] : memref<32x128xbf16, #tpu.memory_space<vmem>>, vector<32x128xbf16>
    %128 = arith.truncf %126 : vector<2x32xf32> to vector<2x32xbf16>
    %cst_80 = arith.constant dense<0.000000e+00> : vector<2x128xf32>
    %129 = tpu.matmul %128, %127, %cst_80 {dimension_numbers = #tpu.dot_dimension_numbers<[1], [0], [0], [1], [0, 0, 1, 1], [], []>} : vector<2x32xbf16>, vector<32x128xbf16>, vector<2x128xf32> -> vector<2x128xf32>
    %130 = vector.broadcast %5 : vector<1x128xf32> to vector<2x128xf32>
    %131 = arith.addf %129, %130 : vector<2x128xf32>
    %c0_81 = arith.constant 0 : index
    %c0_82 = arith.constant 0 : index
    %132 = vector.load %arg11[%c0_81, %c0_82] : memref<2x128xf32, #tpu.memory_space<vmem>>, vector<2x128xf32>
    tpu.vector_store %arg11[%c0_81, %c0_82], %131 {strides = array<i32>} : memref<2x128xf32, #tpu.memory_space<vmem>>, vector<2x128xf32>,
    return
  }
  func.func @transform_0(%arg0: i32) -> (i32, i32) {
    %c0_i32 = arith.constant 0 : i32
    %c0_i32_0 = arith.constant 0 : i32
    return %arg0, %c0_i32 : i32, i32
  }
  func.func @transform_1(%arg0: i32) -> (i32, i32) {
    %c0_i32 = arith.constant 0 : i32
    %c0_i32_0 = arith.constant 0 : i32
    return %arg0, %c0_i32 : i32, i32
  }
  func.func @transform_2(%arg0: i32) -> (i32, i32) {
    %c0_i32 = arith.constant 0 : i32
    %c0_i32_0 = arith.constant 0 : i32
    %c0_i32_1 = arith.constant 0 : i32
    return %c0_i32, %c0_i32_0 : i32, i32
  }
  func.func @transform_3(%arg0: i32) -> (i32, i32) {
    %c0_i32 = arith.constant 0 : i32
    %c0_i32_0 = arith.constant 0 : i32
    %c0_i32_1 = arith.constant 0 : i32
    return %c0_i32, %c0_i32_0 : i32, i32
  }
  func.func @transform_4(%arg0: i32) -> (i32, i32, i32) {
    %c0_i32 = arith.constant 0 : i32
    %c0_i32_0 = arith.constant 0 : i32
    %c0_i32_1 = arith.constant 0 : i32
    %c0_i32_2 = arith.constant 0 : i32
    return %c0_i32, %c0_i32_0, %c0_i32_1 : i32, i32, i32
  }
  func.func @transform_5(%arg0: i32) -> (i32, i32, i32) {
    %c0_i32 = arith.constant 0 : i32
    %c0_i32_0 = arith.constant 0 : i32
    %c0_i32_1 = arith.constant 0 : i32
    %c0_i32_2 = arith.constant 0 : i32
    return %c0_i32, %c0_i32_0, %c0_i32_1 : i32, i32, i32
  }
  func.func @transform_6(%arg0: i32) -> (i32, i32, i32) {
    %c0_i32 = arith.constant 0 : i32
    %c0_i32_0 = arith.constant 0 : i32
    %c0_i32_1 = arith.constant 0 : i32
    %c0_i32_2 = arith.constant 0 : i32
    return %c0_i32, %c0_i32_0, %c0_i32_1 : i32, i32, i32
  }
  func.func @transform_7(%arg0: i32) -> (i32, i32) {
    %c0_i32 = arith.constant 0 : i32
    %c0_i32_0 = arith.constant 0 : i32
    %c0_i32_1 = arith.constant 0 : i32
    return %c0_i32, %c0_i32_0 : i32, i32
  }
  func.func @transform_8(%arg0: i32) -> (i32, i32) {
    %c0_i32 = arith.constant 0 : i32
    %c0_i32_0 = arith.constant 0 : i32
    %c0_i32_1 = arith.constant 0 : i32
    return %c0_i32, %c0_i32_0 : i32, i32
  }
  func.func @transform_9(%arg0: i32) -> (i32, i32) {
    %c0_i32 = arith.constant 0 : i32
    %c0_i32_0 = arith.constant 0 : i32
    %c0_i32_1 = arith.constant 0 : i32
    return %c0_i32, %c0_i32_0 : i32, i32
  }
  func.func @transform_10(%arg0: i32) -> (i32, i32) {
    %c0_i32 = arith.constant 0 : i32
    %c0_i32_0 = arith.constant 0 : i32
    return %arg0, %c0_i32 : i32, i32
  }
}

</mosaic_0001>

<bundles_post_ra>
// kernel: lenet5_forward.1
= control target key start
LH: loop header
LB: loop body
LE: loop exit
PB: predicated region body
PF: predicated region fallthrough
CT: control target
= control target key end

     0   :  { %v2742_v1 = vmov 0   ;;  %vm155_vm0 = vcmask 1045504   ;;  %vm148_vm1 = vcmask 97280   ;;  %s3446_s0 = inlined_call_operand.vmem [shape: bf16[24,140], index: 0, kind: input, shape index: {}]   ;;  %s3447_s1 = inlined_call_operand.vmem [shape: bf16[24,140], index: 1, kind: input, shape index: {}]   ;;  %s3448_s2 = inlined_call_operand.vmem [shape: bf16[140,72], index: 2, kind: input, shape index: {}]   ;;  %s3449_s3 = inlined_call_operand.vmem [shape: bf16[140,72], index: 3, kind: input, shape index: {}]   ;;  %s3450_s4 = inlined_call_operand.vmem [shape: bf16[5,72,64], index: 4, kind: input, shape index: {}]   ;;  %s3451_s5 = inlined_call_operand.vmem [shape: bf16[5,72,64], index: 5, kind: input, shape index: {}]   ;;  %s3452_s6 = inlined_call_operand.vmem [shape: bf16[4,64,64], index: 6, kind: input, shape index: {}]   ;;  %s3453_s7 = inlined_call_operand.vmem [shape: bf16[64,32], index: 7, kind: input, shape index: {}]   ;;  %s3454_s8 = inlined_call_operand.vmem [shape: bf16[32,128], index: 8, kind: input, shape index: {}]   ;;  %s3455_s9 = inlined_call_operand.vmem [shape: f32[5,128], index: 9, kind: input, shape index: {}]   ;;  %s3456_s10 = inlined_call_operand.hbm [shape: f32[2,128], index: 10, kind: output, shape index: {}]  }
   0x1   :  { %v2805_v0 = vld [vmem:[%s3448_s2 + $0x38] sm:$0xff]   ;;  %159 = vmatprep.subr.bf16.mxu0 %v2742_v1  ;;  %263 = vmatprep.subr.bf16.mxu1 %v2742_v1  ;;  %v2818_v3 = vld [vmem:[%s3448_s2 + $0x30] sm:$0xff]   ;;  %v2832_v5 = vld [vmem:[%s3448_s2 + $0x28] sm:$0xff]  }
   0x2   :  { %v2812_v2 = vld [vmem:[%s3449_s3 + $0x38] sm:$0xff]   ;;  %160 = vmatpush1.bf16.msra.mxu0 %v2805_v0  ;;  %v2825_v4 = vld [vmem:[%s3449_s3 + $0x30] sm:$0xff]   ;;  %v2839_v6 = vld [vmem:[%s3449_s3 + $0x28] sm:$0xff]  }
   0x3   :  { %264 = vmatpush1.bf16.msra.mxu1 %v2812_v2  ;;  %161 = vmatprep.subr.bf16.mxu0 %v2742_v1  ;;  %v2846_v7 = vld [vmem:[%s3448_s2 + $0x20] sm:$0xff]   ;;  %v2860_v9 = vld [vmem:[%s3448_s2 + $0x18] sm:$0xff]   ;;  %v2880_v13 = vld [vmem:[%s3448_s2 + $0x10] sm:$0xff]  }
   0x4   :  { %265 = vmatprep.subr.bf16.mxu1 %v2742_v1  ;;  %v2853_v8 = vld [vmem:[%s3449_s3 + $0x20] sm:$0xff]   ;;  %v2867_v10 = vld [vmem:[%s3449_s3 + $0x18] sm:$0xff]   ;;  %v2630_v14 = vld [vmem:[%s3449_s3 + $0x10] sm:$0xff]  }
   0x5   :  { %v2635_v11 = vld [vmem:[%s3448_s2 + $0x40] sm:$0x3f]   ;;  %v2631_v16 = vld [vmem:[%s3448_s2 + $0x8] sm:$0xff]   ;;  %v40_v23 = vld [vmem:[%s3446_s0 + $0x10] sm:$0xff] }
   0x6   :  { %162 = vmatpush1.bf16.msra.mxu0 %v2818_v3  ;;  %v2636_v12 = vld [vmem:[%s3449_s3 + $0x40] sm:$0x3f]   ;;  %v2632_v17 = vld [vmem:[%s3449_s3 + $0x8] sm:$0xff]   ;;  %v2897_v18 = vsel %vm155_vm0, %v2635_v11, 0  ;;  %v2098_v24 = vcombine.high %v40_v23, %v40_v23  ;;  %v2097_v25 = vcombine.low %v40_v23, %v40_v23 }
   0x7   :  { %266 = vmatpush1.bf16.msra.mxu1 %v2825_v4  ;;  %163 = vmatprep.subr.bf16.mxu0 %v2742_v1  ;;  %v2639_v15 = vld [vmem:[%s3446_s0 + $0x4] ss:$8 sps:$4 sm:$0xff]   ;;  %v2899_v19 = vsel %vm155_vm0, %v2636_v12, 0  ;;  %v2637_v22 = vld [vmem:[%s3446_s0] ss:$8 sps:$4 sm:$0xff]  }
   0x8   :  { %267 = vmatprep.subr.bf16.mxu1 %v2742_v1  ;;  %2108 = vmatprep.mubr.msk.bf16.mxu0 %vm148_vm1, %v2639_v15  ;;  %v2633_v20 = vld [vmem:[%s3448_s2] sm:$0xff]  }
   0x9   :  { %2119 = vmatprep.mubr.msk.bf16.mxu1 %vm148_vm1, %v2639_v15  ;;  %v2634_v21 = vld [vmem:[%s3449_s3] sm:$0xff]  }
   0xa   :  { %164 = vmatpush1.bf16.msra.mxu0 %v2832_v5  ;;  %v2644_v26 = vld [vmem:[%s3447_s1 + $0x4] ss:$8 sps:$4 sm:$0xff]  }
   0xb   :  { %268 = vmatpush1.bf16.msra.mxu1 %v2839_v6  ;;  %165 = vmatprep.subr.bf16.mxu0 %v2742_v1 }
   0xc   :  { %269 = vmatprep.subr.bf16.mxu1 %v2742_v1 }
   0xe   :  { %166 = vmatpush1.bf16.msra.mxu0 %v2846_v7 }
   0xf   :  { %270 = vmatpush1.bf16.msra.mxu1 %v2853_v8  ;;  %167 = vmatprep.subr.bf16.mxu0 %v2742_v1 }
  0x10   :  { %271 = vmatprep.subr.bf16.mxu1 %v2742_v1 }
  0x12   :  { %168 = vmatpush1.bf16.msra.mxu0 %v2860_v9 }
  0x13   :  { %272 = vmatpush1.bf16.msra.mxu1 %v2867_v10  ;;  %169 = vmatprep.subr.bf16.mxu0 %v2742_v1 }
  0x14   :  { %273 = vmatprep.subr.bf16.mxu1 %v2742_v1 }
  0x16   :  { %170 = vmatpush1.bf16.msra.mxu0 %v2880_v13 }
  0x17   :  { %274 = vmatpush1.bf16.msra.mxu1 %v2630_v14  ;;  %171 = vmatprep.subr.bf16.mxu0 %v2742_v1 }
  0x18   :  { %275 = vmatprep.subr.bf16.mxu1 %v2742_v1 }
  0x1a   :  { %172 = vmatpush1.bf16.msra.mxu0 %v2631_v16 }
  0x1b   :  { %276 = vmatpush1.bf16.msra.mxu1 %v2632_v17  ;;  %173 = vmatprep.subr.bf16.mxu0 %v2742_v1 }
  0x1c   :  { %277 = vmatprep.subr.bf16.mxu1 %v2742_v1 }
  0x1e   :  { %174 = vmatpush1.bf16.msra.mxu0 %v2633_v20 }
  0x1f   :  { %278 = vmatpush1.bf16.msra.mxu1 %v2634_v21  ;;  %189 = vmatprep.subr.bf16.mxu0 %v2742_v1 }
  0x20   :  { %293 = vmatprep.subr.bf16.mxu1 %v2742_v1 }
  0x22   :  { %190 = vmatpush2.bf16.msra.mxu0 %v2897_v18 }
  0x23   :  { %294 = vmatpush2.bf16.msra.mxu1 %v2899_v19  ;;  %335 = vmatprep.subr.bf16.mxu0 %v2742_v1 }
  0x24   :  { %383 = vmatprep.subr.bf16.mxu1 %v2742_v1 }
  0x25   :  { %192 = vmatmul.mubr.bf16.vlgmr.msra.gmra.mxu0 %v2637_v22 }
  0x26   :  { %296 = vmatmul.mubr.bf16.vlgmr.msra.gmra.mxu1 %v2637_v22  ;;  %336 = vmatpush1.bf16.msra.mxu0 %v2805_v0 }
  0x27   :  { %384 = vmatpush1.bf16.msra.mxu1 %v2812_v2  ;;  %337 = vmatprep.subr.bf16.mxu0 %v2742_v1 }
  0x28   :  { %385 = vmatprep.subr.bf16.mxu1 %v2742_v1  ;;  %2109 = vmatprep.mubr.msk.bf16.mxu0 %vm148_vm1, %v2098_v24 }
  0x29   :  { %2120 = vmatprep.mubr.msk.bf16.mxu1 %vm148_vm1, %v2098_v24 }
  0x2a   :  { %338 = vmatpush1.bf16.msra.mxu0 %v2818_v3 }
  0x2b   :  { %386 = vmatpush1.bf16.msra.mxu1 %v2825_v4  ;;  %339 = vmatprep.subr.bf16.mxu0 %v2742_v1 }
  0x2c   :  { %387 = vmatprep.subr.bf16.mxu1 %v2742_v1 }
  0x2d   :  { %200 = vmatmul.mubr.bf16.gmra.mxu0 %v2097_v25 }
  0x2e   :  { %340 = vmatpush1.bf16.msra.mxu0 %v2832_v5  ;;  %304 = vmatmul.mubr.bf16.gmra.mxu1 %v2097_v25 }
  0x2f   :  { %388 = vmatpush1.bf16.msra.mxu1 %v2839_v6  ;;  %341 = vmatprep.subr.bf16.mxu0 %v2742_v1 }
  0x30   :  { %389 = vmatprep.subr.bf16.mxu1 %v2742_v1  ;;  %2125 = vmatprep.mubr.msk.bf16.mxu0 %vm148_vm1, %v2644_v26 }
  0x31   :  { %2127 = vmatprep.mubr.msk.bf16.mxu1 %vm148_vm1, %v2644_v26 }
  0x32   :  { %342 = vmatpush1.bf16.msra.mxu0 %v2846_v7 }
  0x33   :  { %390 = vmatpush1.bf16.msra.mxu1 %v2853_v8  ;;  %343 = vmatprep.subr.bf16.mxu0 %v2742_v1 }
  0x34   :  { %391 = vmatprep.subr.bf16.mxu1 %v2742_v1 }
  0x36   :  { %344 = vmatpush1.bf16.msra.mxu0 %v2860_v9 }
  0x37   :  { %392 = vmatpush1.bf16.msra.mxu1 %v2867_v10  ;;  %345 = vmatprep.subr.bf16.mxu0 %v2742_v1 }
  0x38   :  { %393 = vmatprep.subr.bf16.mxu1 %v2742_v1 }
  0x3a   :  { %346 = vmatpush1.bf16.msra.mxu0 %v2880_v13 }
  0x3b   :  { %394 = vmatpush1.bf16.msra.mxu1 %v2630_v14  ;;  %347 = vmatprep.subr.bf16.mxu0 %v2742_v1 }
  0x3c   :  { %395 = vmatprep.subr.bf16.mxu1 %v2742_v1 }
  0x3e   :  { %348 = vmatpush1.bf16.msra.mxu0 %v2631_v16 }
  0x3f   :  { %396 = vmatpush1.bf16.msra.mxu1 %v2632_v17  ;;  %349 = vmatprep.subr.bf16.mxu0 %v2742_v1 }
  0x40   :  { %397 = vmatprep.subr.bf16.mxu1 %v2742_v1 }
  0x42   :  { %350 = vmatpush1.bf16.msra.mxu0 %v2633_v20 }
  0x43   :  { %15 = vsyncpa [#allocation3], 0  ;;  %398 = vmatpush1.bf16.msra.mxu1 %v2634_v21  ;;  %365 = vmatprep.subr.bf16.mxu0 %v2742_v1  ;;  %v43_v27 = vld [vmem:[%s3447_s1 + $0x10] sm:$0xff]  ;;  %v2642_v28 = vld [vmem:[%s3447_s1] ss:$8 sps:$4 sm:$0xff]   ;;  %vm607_vm2 = vcmask 1043456   ;;  %v437_v60 = vlaneseq }
  0x44   :  { %413 = vmatprep.subr.bf16.mxu1 %v2742_v1  ;;  %v2124_v29 = vcombine.high %v43_v27, %v43_v27  ;;  %v2123_v30 = vcombine.low %v43_v27, %v43_v27  ;;  %v2647_v31 = vld [vmem:[%s3450_s4 + $0x44] ss:$0 sps:$4 sm:$0xff]   ;;  %v2743_v33 = vmov 0.0   ;;  %v2649_v36 = vld [vmem:[%s3450_s4 + $0x3c] sm:$0xff]   ;;  %v2651_v38 = vld [vmem:[%s3450_s4 + $0x34] sm:$0xff]   ;;  %vm2744_vm3 = vmmov 0  }
  0x45   :  { %v2648_v32 = vld [vmem:[%s3451_s5 + $0x44] ss:$0 sps:$4 sm:$0xff]   ;;  %v609_v34 = vsel %vm607_vm2, %v2647_v31, 0  ;;  %v2650_v37 = vld [vmem:[%s3451_s5 + $0x3c] sm:$0xff]   ;;  %v2652_v39 = vld [vmem:[%s3451_s5 + $0x34] sm:$0xff]   ;;  %v3018_v61 = vshrl.u32 %v437_v60, 7 }
  0x46   :  { %366 = vmatpush2.bf16.msra.mxu0 %v2897_v18  ;;  %v690_v35 = vsel %vm607_vm2, %v2648_v32, 0  ;;  %v2653_v40 = vld [vmem:[%s3450_s4 + $0x2c] sm:$0xff]   ;;  %v2655_v42 = vld [vmem:[%s3450_s4 + $0x24] sm:$0xff]   ;;  %v2745_v8 = vmov 1983009808  }
  0x47   :  { %414 = vmatpush2.bf16.msra.mxu1 %v2899_v19  ;;  %2406 = vmatprep.subr.bf16.mxu0 %v2743_v33  ;;  %v2654_v41 = vld [vmem:[%s3451_s5 + $0x2c] sm:$0xff]   ;;  %v2656_v43 = vld [vmem:[%s3451_s5 + $0x24] sm:$0xff]   ;;  %v439_v63 = vsub.s32 0, %v3018_v61  ;;  %v453_v9 = vunpack.c.l.s4 %v2745_v8  ;;  %vm494_vm4 = vsmask.f32 1280 }
  0x48   :  { %2420 = vmatprep.subr.bf16.mxu1 %v2743_v33  ;;  %v3024_v0 = vld [vmem:[%s3455_s9] sm:$0x1f]  ;;  %vm495_vm5 = vsmask.f32 3336  ;;  %vm497_vm6 = vsmask.f32 5392 }
  0x49   :  { %368 = vmatmul.mubr.bf16.vlgmr.msra.gmra.mxu0 %v2642_v28  ;;  %v440_v7 = vrot.slane %v3024_v0, %v439_v63  ;;  %v454_v17 = vunpack.c.0.s8 %v453_v9  ;;  %vm496_vm7 = vmor %vm494_vm4, %vm495_vm5  ;;  %vm1102_vm8 = vsmask.f32 256  ;;  %vm1103_vm9 = vsmask.f32 2312 }
  0x4a   :  { %416 = vmatmul.mubr.bf16.vlgmr.msra.gmra.mxu1 %v2642_v28  ;;  %2126 = vmatprep.mubr.msk.bf16.mxu0 %vm148_vm1, %v2124_v29  ;;  %vm498_vm10 = vmor %vm496_vm7, %vm497_vm6  ;;  %vm499_vm11 = vsmask.f32 7448  ;;  %vm1105_vm13 = vsmask.f32 4368  ;;  %vm1107_vm0 = vsmask.f32 6424 }
  0x4b   :  { %2128 = vmatprep.mubr.msk.bf16.mxu1 %vm148_vm1, %v2124_v29  ;;  %2407 = vmatpush3.bf16.msra.mxu0 %v609_v34  ;;  %v3028_v27 = vsub.s32 %v454_v17, %v3018_v61  ;;  %vm1104_vm12 = vmor %vm1102_vm8, %vm1103_vm9  ;;  %v2657_v17 = vld [vmem:[%s3450_s4 + $0x20] ss:$0 sps:$4 sm:$0xff]   ;;  %vm603_vm4 = vcmask 588800   ;;  %vm895_vm5 = vcmask 1040384   ;;  %vm896_vm6 = vcmask 1042434  }
  0x4c   :  { %2421 = vmatpush3.bf16.msra.mxu1 %v690_v35  ;;  %2408 = vmatprep.subr.bf16.mxu0 %v2743_v33  ;;  %vm3067_vm14 = vmor %vm498_vm10, %vm499_vm11  ;;  %vm898_vm8 = vcmask 1044484   ;;  %vm900_vm10 = vcmask 1046534  }
  0x4d   :  { %2422 = vmatprep.subr.bf16.mxu1 %v2743_v33  ;;  %vm1106_vm15 = vmor %vm1104_vm12, %vm1105_vm13  ;;  %vm1538_vm12 = vcmask 519170   ;;  %vm1718_vm13 = vcmask 521220  }
  0x4e   :  { %vm3085_vm1 = vmor %vm1106_vm15, %vm1107_vm0  ;;  %vm1573_vm15 = vcmask 1041409   ;;  %vm1600_vm0 = vcmask 523264  }
  0x4f   :  { %2409 = vmatpush3.bf16.msra.mxu0 %v2649_v36  ;;  %vm897_vm7 = vmor %vm895_vm5, %vm896_vm6 }
  0x50   :  { %2423 = vmatpush3.bf16.msra.mxu1 %v2650_v37  ;;  %2410 = vmatprep.subr.bf16.mxu0 %v2743_v33  ;;  %vm899_vm9 = vmor %vm897_vm7, %vm898_vm8 }
  0x51   :  { %376 = vmatmul.mubr.bf16.gmra.mxu0 %v2123_v30  ;;  %2424 = vmatprep.subr.bf16.mxu1 %v2743_v33  ;;  %vm901_vm11 = vmor %vm899_vm9, %vm900_vm10 }
  0x52   :  { %424 = vmatmul.mubr.bf16.gmra.mxu1 %v2123_v30  ;;  %2416 = vmatprep.mubr.msk.bf16.mxu0 %vm2744_vm3, %v2743_v33 }
  0x53   :  { %2411 = vmatpush3.bf16.msra.mxu0 %v2651_v38  ;;  %2430 = vmatprep.mubr.msk.bf16.mxu1 %vm2744_vm3, %v2743_v33 }
  0x54   :  { %2425 = vmatpush3.bf16.msra.mxu1 %v2652_v39  ;;  %2412 = vmatprep.subr.bf16.mxu0 %v2743_v33 }
  0x55   :  { %2426 = vmatprep.subr.bf16.mxu1 %v2743_v33 }
  0x57   :  { %2413 = vmatpush3.bf16.msra.mxu0 %v2653_v40 }
  0x58   :  { %2427 = vmatpush3.bf16.msra.mxu1 %v2654_v41  ;;  %2414 = vmatprep.subr.bf16.mxu0 %v2743_v33 }
  0x59   :  { %2428 = vmatprep.subr.bf16.mxu1 %v2743_v33 }
  0x5b   :  { %2415 = vmatpush3.bf16.msra.mxu0 %v2655_v42 }
  0x5c   :  { %2429 = vmatpush3.bf16.msra.mxu1 %v2656_v43  ;;  %2434 = vmatprep.subr.bf16.mxu0 %v2743_v33 }
  0x5d   :  { %2448 = vmatprep.subr.bf16.mxu1 %v2743_v33 }
  0xe5   :  { %v193_v44 = vpop.f32.mrf.mxu0 }
  0xe6   :  { %v297_v45 = vpop.f32.mrf.mxu1 }
  0xe7   :  { %v195_v46 = vpop.f32.mrf.mxu0  ;;  %v311_v2 = vmax.f32 %v193_v44, %v297_v45 }
  0xe8   :  { %v299_v47 = vpop.f32.mrf.mxu1 }
  0xe9   :  { %v196_v48 = vpop.f32.mrf.mxu0 }
  0xea   :  { %v300_v49 = vpop.f32.mrf.mxu1 }
  0xeb   :  { %v198_v50 = vpop.f32.mrf.mxu0  ;;  %v312_v12 = vmax.f32 %v196_v48, %v300_v49 }
  0xec   :  { %v302_v51 = vpop.f32.mrf.mxu1 }
  0xed   :  { %v201_v52 = vpop.f32.mrf.mxu0 }
  0xee   :  { %v305_v53 = vpop.f32.mrf.mxu1 }
  0xef   :  { %v203_v54 = vpop.f32.mrf.mxu0  ;;  %v313_v21 = vmax.f32 %v201_v52, %v305_v53 }
  0xf0   :  { %v307_v55 = vpop.f32.mrf.mxu1 }
  0xf1   :  { %v204_v56 = vpop.f32.mrf.mxu0 }
  0xf2   :  { %v308_v57 = vpop.f32.mrf.mxu1 }
  0xf3   :  { %v205_v58 = vpop.f32.mrf.mxu0 }
  0xf4   :  { %v309_v59 = vpop.f32.mrf.mxu1 }
 0x109   :  { %v369_v62 = vpop.f32.mrf.mxu0 }
 0x10a   :  { %v417_v1 = vpop.f32.mrf.mxu1 }
 0x10b   :  { %v431_v3 = vmax.f32 %v369_v62, %v417_v1  ;;  %v371_v4 = vpop.f32.mrf.mxu0 }
 0x10c   :  { %v419_v5 = vpop.f32.mrf.mxu1 }
 0x10d   :  { %v434_v6 = vmax.f32 %v311_v2, %v431_v3  ;;  %v372_v10 = vpop.f32.mrf.mxu0 }
 0x10e   :  { %v420_v11 = vpop.f32.mrf.mxu1 }
 0x10f   :  { %v432_v13 = vmax.f32 %v372_v10, %v420_v11  ;;  %v374_v14 = vpop.f32.mrf.mxu0  ;;  %v441_v16 = vadd.f32 %v440_v7, %v434_v6 }
 0x110   :  { %v422_v15 = vpop.f32.mrf.mxu1 }
 0x111   :  { %v435_v18 = vmax.f32 %v312_v12, %v432_v13  ;;  %v377_v19 = vpop.f32.mrf.mxu0  ;;  %v444_v26 = vmax.f32 %v441_v16, 0.0 }
 0x112   :  { %v425_v20 = vpop.f32.mrf.mxu1 }
 0x113   :  { %v442_v22 = vadd.f32 %v440_v7, %v435_v18  ;;  %v433_v23 = vmax.f32 %v377_v19, %v425_v20  ;;  %v379_v24 = vpop.f32.mrf.mxu0 }
 0x114   :  { %v427_v25 = vpop.f32.mrf.mxu1 }
 0x115   :  { %v445_v28 = vmax.f32 %v442_v22, 0.0  ;;  %v436_v29 = vmax.f32 %v313_v21, %v433_v23  ;;  %v380_v30 = vpop.f32.mrf.mxu0  ;;  %v2658_v21 = vld [vmem:[%s3451_s5 + $0x20] ss:$0 sps:$4 sm:$0xff]  }
 0x116   :  { %v428_v31 = vpop.f32.mrf.mxu1 }
 0x117   :  { %v447_v32 = vpack.c.bf16 %v445_v28, %v444_v26  ;;  %v2129_v34 = vpack.c.bf16 %v445_v28, %v445_v28  ;;  %v443_v35 = vadd.f32 %v440_v7, %v436_v29  ;;  %v381_v36 = vpop.f32.mrf.mxu0 }
 0x118   :  { %v429_v37 = vpop.f32.mrf.mxu1 }
 0x119   :  { %v3031_v38 = vrot.slane %v447_v32, %v3028_v27  ;;  %v3034_v39 = vrot.slane %v2129_v34, %v3028_v27  ;;  %v446_v40 = vmax.f32 %v443_v35, 0.0  ;;  %v781_v32 = vsel %vm607_vm2, %v2657_v17, 0 }
 0x11a   :  { %v852_v34 = vsel %vm607_vm2, %v2658_v21, 0 }
 0x11b   :  { %v3038_v41 = vcombine.high %v3031_v38, %v3031_v38  ;;  %v3042_v42 = vcombine.high %v3034_v39, %v3034_v39  ;;  %v502_v43 = vshrl.u32 %v3031_v38, 16  ;;  %v505_v44 = vshll.u32 %v3031_v38, 16 }
 0x11c   :  { %v448_v45 = vpack.c.bf16 %v446_v40, %v446_v40  ;;  %v521_v60 = vshll.u32 %v3034_v39, 16  ;;  %v1115_v1 = vshrl.u32 %v3034_v39, 16 }
 0x11d   :  { %v504_v46 = vrot.slane %v502_v43, 6  ;;  %v507_v47 = vrot.slane %v505_v44, 7  ;;  %v526_v48 = vshrl.u32 %v3042_v42, 16  ;;  %v529_v49 = vshll.u32 %v3042_v42, 16 }
 0x11e   :  { %v3049_v50 = vrot.slane %v448_v45, %v3028_v27  ;;  %v511_v51 = vshll.u32 %v3038_v41, 16  ;;  %v515_v53 = vshrl.u32 %v3038_v41, 16  ;;  %v523_v10 = vrot.slane %v521_v60, 7 }
 0x11f   :  { %v508_v52 = vor.u32 %v507_v47, %v504_v46  ;;  %v528_v54 = vrot.slane %v526_v48, 6  ;;  %v531_v55 = vrot.slane %v529_v49, 7  ;;  %v1117_v12 = vrot.slane %v1115_v1, 7  ;;  %v2662_v1 = vld [vmem:[%s3451_s5 + $0x10] sm:$0xff]  }
 0x120   :  { %v3057_v56 = vcombine.high %v3049_v50, %v3049_v50  ;;  %v535_v57 = vshll.u32 %v3049_v50, 16  ;;  %v539_v58 = vshrl.u32 %v3049_v50, 16  ;;  %v513_v59 = vrot.slane %v511_v51, 7 }
 0x121   :  { %v517_v62 = vrot.slane %v515_v53, 6  ;;  %v532_v63 = vor.u32 %v531_v55, %v528_v54  ;;  %v509_v5 = vrot.slane %v508_v52, 2  ;;  %v1111_v22 = vrot.slane %v515_v53, 7  ;;  %v2659_v54 = vld [vmem:[%s3450_s4 + $0x18] sm:$0xff]  }
 0x122   :  { %v541_v2 = vrot.slane %v539_v58, 6  ;;  %v537_v3 = vrot.slane %v535_v57, 7  ;;  %v545_v4 = vshll.u32 %v3057_v56, 16  ;;  %v2204_v25 = vrot.slane %v502_v43, 9 }
 0x123   :  { %v518_v6 = vor.u32 %v517_v62, %v513_v59  ;;  %v533_v8 = vrot.slane %v532_v63, 2  ;;  %v514_v15 = vsel %vm3067_vm14, %v509_v5, %v513_v59  ;;  %v1112_v26 = vor.u32 %v1111_v22, %v511_v51  ;;  %v2661_v63 = vld [vmem:[%s3450_s4 + $0x10] sm:$0xff]   ;;  %v2664_v5 = vld [vmem:[%s3451_s5 + $0x8] sm:$0xff]  }
 0x124   :  { %v542_v9 = vor.u32 %v541_v2, %v537_v3  ;;  %v547_v14 = vrot.slane %v545_v4, 7  ;;  %v1114_v28 = vrot.slane %v1111_v22, 2  ;;  %v1118_v29 = vor.u32 %v1117_v12, %v521_v60  ;;  %v2667_v12 = vld [vmem:[%s3450_s4 + $0x68] ss:$0 sps:$4 sm:$0xff]  }
 0x125   :  { %v519_v11 = vrot.slane %v518_v6, 2  ;;  %v538_v18 = vsel %vm3067_vm14, %v533_v8, %v537_v3  ;;  %v1113_v35 = vsel %vm3085_vm1, %v2204_v25, %v1112_v26  ;;  %v1122_v37 = vrot.slane %v539_v58, 7 }
 0x126   :  { %v543_v13 = vrot.slane %v542_v9, 2  ;;  %v1119_v36 = vsel %vm3085_vm1, %v1114_v28, %v1118_v29  ;;  %v1126_v43 = vshrl.u32 %v3057_v56, 16  ;;  %v1327_v45 = vcombine.low %v3038_v41, %v3034_v39  ;;  %v2665_v9 = vld [vmem:[%s3450_s4] sm:$0xff]   ;;  %v2673_v28 = vld [vmem:[%s3450_s4 + $0x50] sm:$0xff]  }
 0x127   :  { %v524_v16 = vsel %vm3067_vm14, %v519_v11, %v523_v10  ;;  %v1141_v44 = vcombine.low %v1113_v35, %v1119_v36  ;;  %v2205_v46 = vrot.slane %v526_v48, 9  ;;  %v1123_v47 = vor.u32 %v1122_v37, %v535_v57  ;;  %v2660_v48 = vld [vmem:[%s3451_s5 + $0x18] sm:$0xff]   ;;  %v2666_v10 = vld [vmem:[%s3451_s5] sm:$0xff]   ;;  %v2674_v29 = vld [vmem:[%s3451_s5 + $0x50] sm:$0xff]  }
 0x128   :  { %v548_v19 = vsel %vm3067_vm14, %v543_v13, %v547_v14  ;;  %v559_v20 = vcombine.low %v514_v15, %v524_v16  ;;  %v1328_v49 = vcombine.low %v3049_v50, %v3057_v56  ;;  %v1128_v51 = vrot.slane %v1126_v43, 7  ;;  %v2668_v13 = vld [vmem:[%s3451_s5 + $0x68] ss:$0 sps:$4 sm:$0xff]  }
 0x129   :  { %v560_v23 = vcombine.low %v538_v18, %v548_v19  ;;  %v1149_v52 = vrot.slane %v1141_v44, %v3028_v27  ;;  %v1335_v53 = vrot.slane %v1327_v45, %v3028_v27  ;;  %v1124_v55 = vsel %vm3085_vm1, %v2205_v46, %v1123_v47  ;;  %v2669_v19 = vld [vmem:[%s3450_s4 + $0x60] sm:$0xff]   ;;  %v2675_v35 = vld [vmem:[%s3450_s4 + $0x48] sm:$0xff]  }
 0x12a   :  { %v567_v30 = vrot.slane %v559_v20, %v3028_v27  ;;  %v1342_v57 = vrot.slane %v1328_v49, %v3028_v27  ;;  %v1125_v58 = vrot.slane %v1122_v37, 2  ;;  %v1129_v59 = vor.u32 %v1128_v51, %v545_v4  ;;  %v2663_v4 = vld [vmem:[%s3450_s4 + $0x8] sm:$0xff]   ;;  %v2670_v20 = vld [vmem:[%s3451_s5 + $0x60] sm:$0xff]  }
 0x12b   :  { %v574_v31 = vrot.slane %v560_v23, %v3028_v27  ;;  %v734_v7 = vcombine.low %v3042_v42, %v3049_v50  ;;  %v733_v8 = vcombine.low %v3031_v38, %v3038_v41  ;;  %v974_v16 = vsel %vm607_vm2, %v2667_v12, 0  ;;  %v2672_v23 = vld [vmem:[%s3451_s5 + $0x58] sm:$0xff]   ;;  %v2676_v36 = vld [vmem:[%s3451_s5 + $0x48] sm:$0xff]   ;;  %v2703_v12 = vld [vmem:[%s3452_s6 + $0x20] sm:$0xff]  }
 0x12c   :  { %v3123_v60 = vcombine.low %v1335_v53, %v1342_v57  ;;  %v1130_v62 = vsel %vm3085_vm1, %v1125_v58, %v1129_v59  ;;  %v1055_v17 = vsel %vm607_vm2, %v2668_v13, 0  ;;  %v911_v18 = vrot.slane %v3049_v50, 7  ;;  %v2677_v37 = vld [vmem:[%s3450_s4 + $0x8c] ss:$0 sps:$4 sm:$0xff]   ;;  %v2680_v47 = vld [vmem:[%s3451_s5 + $0x84] sm:$0xff]   ;;  %v2681_v49 = vld [vmem:[%s3450_s4 + $0x7c] sm:$0xff]  }
 0x12d   :  { %v575_v40 = vcombine.low %v567_v30, %v574_v31  ;;  %v1142_v2 = vcombine.low %v1124_v55, %v1130_v62  ;;  %v748_v11 = vrot.slane %v734_v7, %v3028_v27  ;;  %v741_v14 = vrot.slane %v733_v8, %v3028_v27  ;;  %v2682_v51 = vld [vmem:[%s3451_s5 + $0x7c] sm:$0xff]   ;;  %v2684_v53 = vld [vmem:[%s3451_s5 + $0x74] sm:$0xff]   ;;  %v2687_v55 = vld [vmem:[%s3450_s4 + $0xb0] ss:$0 sps:$4 sm:$0xff]  }
 0x12e   :  { %v904_v21 = vrot.slane %v3038_v41, 7  ;;  %v913_v50 = vrot.slane %v911_v18, 2  ;;  %v914_v22 = vrot.slane %v3057_v56, 7  ;;  %v2671_v41 = vld [vmem:[%s3450_s4 + $0x58] sm:$0xff]   ;;  %v907_v25 = vrot.slane %v3034_v39, 7  ;;  %v2689_v62 = vld [vmem:[%s3450_s4 + $0xa8] sm:$0xff]  }
 0x12f   :  { %2417 = vmatmul.mubr.msk.bf16.vlgmr.msra.gmra.mxu0 %vm603_vm4, %v575_v40  ;;  %2431 = vmatmul.mubr.msk.bf16.vlgmr.msra.gmra.mxu1 %vm603_vm4, %v575_v40  ;;  %v1156_v3 = vrot.slane %v1142_v2, %v3028_v27  ;;  %v749_v15 = vcombine.low %v741_v14, %v748_v11  ;;  %v2173_v56 = vrot.slane %v3042_v42, 9  ;;  %v2172_v30 = vrot.slane %v3031_v38, 9  ;;  %v2678_v40 = vld [vmem:[%s3451_s5 + $0x8c] ss:$0 sps:$4 sm:$0xff]   ;;  %v2688_v57 = vld [vmem:[%s3451_s5 + $0xb0] ss:$0 sps:$4 sm:$0xff]  }
 0x130   :  { %2435 = vmatpush3.bf16.msra.mxu0 %v781_v32  ;;  %2449 = vmatpush3.bf16.msra.mxu1 %v852_v34  ;;  %v906_v24 = vrot.slane %v904_v21, 2  ;;  %v915_v26 = vsel %vm901_vm11, %v913_v50, %v914_v22  ;;  %v1189_v45 = vsel %vm607_vm2, %v2677_v37, 0  ;;  %v1270_v46 = vsel %vm607_vm2, %v2678_v40, 0  ;;  %v2692_v2 = vld [vmem:[%s3451_s5 + $0xa0] sm:$0xff]   ;;  %v2697_v7 = vld [vmem:[%s3452_s6 + $0x38] sm:$0xff]   ;;  %v2702_v11 = vld [vmem:[%s3452_s6 + $0x8] sm:$0xff]  }
 0x131   :  { %2436 = vmatprep.subr.bf16.mxu0 %v2743_v33  ;;  %2450 = vmatprep.subr.bf16.mxu1 %v2743_v33  ;;  %v3142_v6 = vcombine.low %v1149_v52, %v1156_v3  ;;  %v912_v32 = vsel %vm901_vm11, %v2173_v56, %v911_v18  ;;  %v905_v42 = vsel %vm901_vm11, %v2172_v30, %v904_v21  ;;  %v2683_v52 = vld [vmem:[%s3450_s4 + $0x74] sm:$0xff]   ;;  %v1375_v58 = vsel %vm607_vm2, %v2687_v55, 0  ;;  %v2704_v13 = vld [vmem:[%s3452_s6] sm:$0xff]  }
 0x132   :  { %2444 = vmatprep.mubr.msk.bf16.mxu0 %vm2744_vm3, %v2743_v33  ;;  %2458 = vmatprep.mubr.msk.bf16.mxu1 %vm2744_vm3, %v2743_v33  ;;  %v908_v31 = vsel %vm901_vm11, %v906_v24, %v907_v25  ;;  %v927_v39 = vcombine.low %v912_v32, %v915_v26  ;;  %v1456_v59 = vsel %vm607_vm2, %v2688_v57, 0  ;;  %v2693_v3 = vld [vmem:[%s3450_s4 + $0x98] sm:$0xff]   ;;  %vm1505_vm2 = vcmask 517120  }
 0x133   :  { %v926_v34 = vcombine.low %v905_v42, %v908_v31  ;;  %v2698_v8 = vld [vmem:[%s3452_s6 + $0x18] sm:$0xff]   ;;  %vm1823_vm14 = vcmask 523270  }
 0x134   :  { %2437 = vmatpush3.bf16.msra.mxu0 %v2659_v54  ;;  %2451 = vmatpush3.bf16.msra.mxu1 %v2660_v48  ;;  %v941_v38 = vrot.slane %v927_v39, %v3028_v27  ;;  %v2685_v54 = vld [vmem:[%s3450_s4 + $0x6c] sm:$0xff]  }
 0x135   :  { %2438 = vmatprep.subr.bf16.mxu0 %v2743_v33  ;;  %2452 = vmatprep.subr.bf16.mxu1 %v2743_v33  ;;  %v934_v43 = vrot.slane %v926_v34, %v3028_v27  ;;  %v2679_v27 = vld [vmem:[%s3450_s4 + $0x84] sm:$0xff]   ;;  %v2686_v48 = vld [vmem:[%s3451_s5 + $0x6c] sm:$0xff]  }
 0x137   :  { %v942_v44 = vcombine.low %v934_v43, %v941_v38 }
 0x138   :  { %2439 = vmatpush3.bf16.msra.mxu0 %v2661_v63  ;;  %2453 = vmatpush3.bf16.msra.mxu1 %v2662_v1  ;;  %v2690_v63 = vld [vmem:[%s3451_s5 + $0xa8] sm:$0xff]   ;;  %v2691_v1 = vld [vmem:[%s3450_s4 + $0xa0] sm:$0xff]  }
 0x139   :  { %2440 = vmatprep.subr.bf16.mxu0 %v2743_v33  ;;  %2454 = vmatprep.subr.bf16.mxu1 %v2743_v33 }
 0x13c   :  { %2441 = vmatpush3.bf16.msra.mxu0 %v2663_v4  ;;  %2455 = vmatpush3.bf16.msra.mxu1 %v2664_v5  ;;  %v2694_v4 = vld [vmem:[%s3451_s5 + $0x98] sm:$0xff]   ;;  %v2695_v5 = vld [vmem:[%s3450_s4 + $0x90] sm:$0xff]  }
 0x13d   :  { %2442 = vmatprep.subr.bf16.mxu0 %v2743_v33  ;;  %2456 = vmatprep.subr.bf16.mxu1 %v2743_v33 }
 0x140   :  { %2443 = vmatpush3.bf16.msra.mxu0 %v2665_v9  ;;  %2457 = vmatpush3.bf16.msra.mxu1 %v2666_v10  ;;  %v2700_v9 = vld [vmem:[%s3452_s6 + $0x10] sm:$0xff]   ;;  %v2701_v10 = vld [vmem:[%s3452_s6 + $0x28] sm:$0xff]  }
 0x141   :  { %2462 = vmatprep.subr.bf16.mxu0 %v2743_v33  ;;  %2476 = vmatprep.subr.bf16.mxu1 %v2743_v33 }
 0x143   :  { %2445 = vmatmul.mubr.msk.bf16.vlgmr.msra.gmra.mxu0 %vm603_vm4, %v749_v15  ;;  %2459 = vmatmul.mubr.msk.bf16.vlgmr.msra.gmra.mxu1 %vm603_vm4, %v749_v15 }
 0x144   :  { %2463 = vmatpush3.bf16.msra.mxu0 %v974_v16  ;;  %2477 = vmatpush3.bf16.msra.mxu1 %v1055_v17 }
 0x145   :  { %2464 = vmatprep.subr.bf16.mxu0 %v2743_v33  ;;  %2478 = vmatprep.subr.bf16.mxu1 %v2743_v33 }
 0x146   :  { %2472 = vmatprep.mubr.msk.bf16.mxu0 %vm2744_vm3, %v2743_v33  ;;  %2486 = vmatprep.mubr.msk.bf16.mxu1 %vm2744_vm3, %v2743_v33 }
 0x148   :  { %2465 = vmatpush3.bf16.msra.mxu0 %v2669_v19  ;;  %2479 = vmatpush3.bf16.msra.mxu1 %v2670_v20 }
 0x149   :  { %2466 = vmatprep.subr.bf16.mxu0 %v2743_v33  ;;  %2480 = vmatprep.subr.bf16.mxu1 %v2743_v33 }
 0x14c   :  { %2467 = vmatpush3.bf16.msra.mxu0 %v2671_v41  ;;  %2481 = vmatpush3.bf16.msra.mxu1 %v2672_v23 }
 0x14d   :  { %2468 = vmatprep.subr.bf16.mxu0 %v2743_v33  ;;  %2482 = vmatprep.subr.bf16.mxu1 %v2743_v33 }
 0x150   :  { %2469 = vmatpush3.bf16.msra.mxu0 %v2673_v28  ;;  %2483 = vmatpush3.bf16.msra.mxu1 %v2674_v29 }
 0x151   :  { %2470 = vmatprep.subr.bf16.mxu0 %v2743_v33  ;;  %2484 = vmatprep.subr.bf16.mxu1 %v2743_v33 }
 0x154   :  { %2471 = vmatpush3.bf16.msra.mxu0 %v2675_v35  ;;  %2485 = vmatpush3.bf16.msra.mxu1 %v2676_v36 }
 0x155   :  { %2490 = vmatprep.subr.bf16.mxu0 %v2743_v33  ;;  %2504 = vmatprep.subr.bf16.mxu1 %v2743_v33 }
 0x157   :  { %2473 = vmatmul.mubr.msk.bf16.vlgmr.msra.gmra.mxu0 %vm603_vm4, %v942_v44  ;;  %2487 = vmatmul.mubr.msk.bf16.vlgmr.msra.gmra.mxu1 %vm603_vm4, %v942_v44 }
 0x158   :  { %2491 = vmatpush3.bf16.msra.mxu0 %v1189_v45  ;;  %2505 = vmatpush3.bf16.msra.mxu1 %v1270_v46 }
 0x159   :  { %2492 = vmatprep.subr.bf16.mxu0 %v2743_v33  ;;  %2506 = vmatprep.subr.bf16.mxu1 %v2743_v33 }
 0x15a   :  { %2500 = vmatprep.mubr.msk.bf16.mxu0 %vm2744_vm3, %v2743_v33  ;;  %2514 = vmatprep.mubr.msk.bf16.mxu1 %vm2744_vm3, %v2743_v33 }
 0x15c   :  { %2493 = vmatpush3.bf16.msra.mxu0 %v2679_v27  ;;  %2507 = vmatpush3.bf16.msra.mxu1 %v2680_v47 }
 0x15d   :  { %2494 = vmatprep.subr.bf16.mxu0 %v2743_v33  ;;  %2508 = vmatprep.subr.bf16.mxu1 %v2743_v33 }
 0x160   :  { %2495 = vmatpush3.bf16.msra.mxu0 %v2681_v49  ;;  %2509 = vmatpush3.bf16.msra.mxu1 %v2682_v51 }
 0x161   :  { %2496 = vmatprep.subr.bf16.mxu0 %v2743_v33  ;;  %2510 = vmatprep.subr.bf16.mxu1 %v2743_v33 }
 0x164   :  { %2497 = vmatpush3.bf16.msra.mxu0 %v2683_v52  ;;  %2511 = vmatpush3.bf16.msra.mxu1 %v2684_v53 }
 0x165   :  { %2498 = vmatprep.subr.bf16.mxu0 %v2743_v33  ;;  %2512 = vmatprep.subr.bf16.mxu1 %v2743_v33 }
 0x168   :  { %2499 = vmatpush3.bf16.msra.mxu0 %v2685_v54  ;;  %2513 = vmatpush3.bf16.msra.mxu1 %v2686_v48 }
 0x169   :  { %2518 = vmatprep.subr.bf16.mxu0 %v2743_v33  ;;  %2532 = vmatprep.subr.bf16.mxu1 %v2743_v33 }
 0x16b   :  { %2501 = vmatmul.mubr.msk.bf16.vlgmr.msra.gmra.mxu0 %vm603_vm4, %v3142_v6  ;;  %2515 = vmatmul.mubr.msk.bf16.vlgmr.msra.gmra.mxu1 %vm603_vm4, %v3142_v6  ;;  %v2696_v6 = vld [vmem:[%s3451_s5 + $0x90] sm:$0xff]  }
 0x16c   :  { %2519 = vmatpush3.bf16.msra.mxu0 %v1375_v58  ;;  %2533 = vmatpush3.bf16.msra.mxu1 %v1456_v59 }
 0x16d   :  { %2520 = vmatprep.subr.bf16.mxu0 %v2743_v33  ;;  %2534 = vmatprep.subr.bf16.mxu1 %v2743_v33 }
 0x16e   :  { %2528 = vmatprep.mubr.msk.bf16.mxu0 %vm2744_vm3, %v2743_v33  ;;  %2542 = vmatprep.mubr.msk.bf16.mxu1 %vm2744_vm3, %v2743_v33 }
 0x170   :  { %2521 = vmatpush3.bf16.msra.mxu0 %v2689_v62  ;;  %2535 = vmatpush3.bf16.msra.mxu1 %v2690_v63 }
 0x171   :  { %2522 = vmatprep.subr.bf16.mxu0 %v2743_v33  ;;  %2536 = vmatprep.subr.bf16.mxu1 %v2743_v33 }
 0x174   :  { %2523 = vmatpush3.bf16.msra.mxu0 %v2691_v1  ;;  %2537 = vmatpush3.bf16.msra.mxu1 %v2692_v2 }
 0x175   :  { %2524 = vmatprep.subr.bf16.mxu0 %v2743_v33  ;;  %2538 = vmatprep.subr.bf16.mxu1 %v2743_v33 }
 0x178   :  { %2525 = vmatpush3.bf16.msra.mxu0 %v2693_v3  ;;  %2539 = vmatpush3.bf16.msra.mxu1 %v2694_v4  ;;  %v1522_v3 = vsub.s32 1, %v3018_v61 }
 0x179   :  { %2526 = vmatprep.subr.bf16.mxu0 %v2743_v33  ;;  %2540 = vmatprep.subr.bf16.mxu1 %v2743_v33 }
 0x17c   :  { %2527 = vmatpush3.bf16.msra.mxu0 %v2695_v5  ;;  %2541 = vmatpush3.bf16.msra.mxu1 %v2696_v6 }
 0x17d   :  { %2546 = vmatprep.subr.bf16.mxu0 %v2743_v33  ;;  %2558 = vmatprep.subr.bf16.mxu1 %v2743_v33 }
 0x17f   :  { %2529 = vmatmul.mubr.msk.bf16.vlgmr.msra.gmra.mxu0 %vm603_vm4, %v3123_v60  ;;  %2543 = vmatmul.mubr.msk.bf16.vlgmr.msra.gmra.mxu1 %vm603_vm4, %v3123_v60  ;;  %v2699_v60 = vld [vmem:[%s3452_s6 + $0x30] sm:$0xff]  }
 0x180   :  { %2554 = vmatprep.mubr.msk.bf16.mxu0 %vm2744_vm3, %v2743_v33  ;;  %2566 = vmatprep.mubr.msk.bf16.mxu1 %vm2744_vm3, %v2743_v33 }
 0x181   :  { %2547 = vmatpush3.bf16.msra.mxu0 %v2697_v7  ;;  %2559 = vmatpush3.bf16.msra.mxu1 %v2698_v8 }
 0x182   :  { %2548 = vmatprep.subr.bf16.mxu0 %v2743_v33  ;;  %2560 = vmatprep.subr.bf16.mxu1 %v2743_v33 }
 0x185   :  { %2549 = vmatpush3.bf16.msra.mxu0 %v2699_v60  ;;  %2561 = vmatpush3.bf16.msra.mxu1 %v2700_v9 }
 0x186   :  { %2550 = vmatprep.subr.bf16.mxu0 %v2743_v33  ;;  %2562 = vmatprep.subr.bf16.mxu1 %v2743_v33 }
 0x189   :  { %2551 = vmatpush3.bf16.msra.mxu0 %v2701_v10  ;;  %2563 = vmatpush3.bf16.msra.mxu1 %v2702_v11 }
 0x18a   :  { %2552 = vmatprep.subr.bf16.mxu0 %v2743_v33  ;;  %2564 = vmatprep.subr.bf16.mxu1 %v2743_v33 }
 0x18d   :  { %2553 = vmatpush3.bf16.msra.mxu0 %v2703_v12  ;;  %2565 = vmatpush3.bf16.msra.mxu1 %v2704_v13 }
 0x18e   :  { %2570 = vmatprep.subr.bf16.mxu0 %v2743_v33  ;;  %2582 = vmatprep.subr.bf16.mxu1 %v2743_v33 }
 0x1ef   :  { %v645_v14 = vpop.f32.mrf.mxu0  ;;  %v726_v15 = vpop.f32.mrf.mxu1 }
 0x1f1   :  { %v2418_v16 = vpop.f32.mrf.mxu0  ;;  %v2432_v17 = vpop.f32.mrf.mxu1 }
 0x1f3   :  { %v648_v18 = vpop.f32.mrf.mxu0  ;;  %v729_v19 = vpop.f32.mrf.mxu1 }
 0x1f5   :  { %v2419_v20 = vpop.f32.mrf.mxu0  ;;  %v2433_v21 = vpop.f32.mrf.mxu1 }
 0x203   :  { %v817_v50 = vpop.f32.mrf.mxu0  ;;  %v888_v22 = vpop.f32.mrf.mxu1 }
 0x204   :  { %v818_v46 = vadd.f32 %v817_v50, %v645_v14  ;;  %v889_v27 = vadd.f32 %v888_v22, %v726_v15  ;;  %v1523_v22 = vrot.slane %v3024_v0, %v1522_v3 }
 0x205   :  { %v2446_v41 = vpop.f32.mrf.mxu0  ;;  %v2460_v23 = vpop.f32.mrf.mxu1 }
 0x207   :  { %v820_v24 = vpop.f32.mrf.mxu0  ;;  %v891_v25 = vpop.f32.mrf.mxu1 }
 0x208   :  { %v821_v53 = vadd.f32 %v820_v24, %v648_v18  ;;  %v892_v54 = vadd.f32 %v891_v25, %v729_v19 }
 0x209   :  { %v2447_v56 = vpop.f32.mrf.mxu0  ;;  %v2461_v26 = vpop.f32.mrf.mxu1 }
 0x217   :  { %v1010_v28 = vpop.f32.mrf.mxu0  ;;  %v1091_v29 = vpop.f32.mrf.mxu1 }
 0x218   :  { %v1098_v47 = vadd.f32 %v1010_v28, %v818_v46  ;;  %v1100_v49 = vadd.f32 %v1091_v29, %v889_v27 }
 0x219   :  { %v2474_v30 = vpop.f32.mrf.mxu0  ;;  %v2488_v31 = vpop.f32.mrf.mxu1 }
 0x21b   :  { %v1013_v32 = vpop.f32.mrf.mxu0  ;;  %v1094_v39 = vpop.f32.mrf.mxu1 }
 0x21c   :  { %v1099_v59 = vadd.f32 %v1013_v32, %v821_v53  ;;  %v1101_v62 = vadd.f32 %v1094_v39, %v892_v54 }
 0x21d   :  { %v2475_v42 = vpop.f32.mrf.mxu0  ;;  %v2489_v34 = vpop.f32.mrf.mxu1 }
 0x22b   :  { %v1225_v35 = vpop.f32.mrf.mxu0  ;;  %v1306_v36 = vpop.f32.mrf.mxu1 }
 0x22c   :  { %v1313_v51 = vadd.f32 %v1225_v35, %v1098_v47  ;;  %v1315_v52 = vadd.f32 %v1306_v36, %v1100_v49 }
 0x22d   :  { %v2502_v38 = vpop.f32.mrf.mxu0  ;;  %v2516_v37 = vpop.f32.mrf.mxu1 }
 0x22f   :  { %v1228_v40 = vpop.f32.mrf.mxu0  ;;  %v1309_v43 = vpop.f32.mrf.mxu1 }
 0x230   :  { %v1314_v4 = vadd.f32 %v1228_v40, %v1099_v59  ;;  %v1316_v5 = vadd.f32 %v1309_v43, %v1101_v62 }
 0x231   :  { %v2503_v44 = vpop.f32.mrf.mxu0  ;;  %v2517_v45 = vpop.f32.mrf.mxu1 }
 0x23f   :  { %v1411_v48 = vpop.f32.mrf.mxu0  ;;  %v1492_v55 = vpop.f32.mrf.mxu1 }
 0x240   :  { %v1499_v57 = vadd.f32 %v1411_v48, %v1313_v51  ;;  %v1501_v58 = vadd.f32 %v1492_v55, %v1315_v52 }
 0x241   :  { %v2530_v63 = vpop.f32.mrf.mxu0  ;;  %v2544_v1 = vpop.f32.mrf.mxu1 }
 0x242   :  { %v1503_v2 = vmax.f32 %v1499_v57, %v1501_v58 }
 0x243   :  { %v1414_v6 = vpop.f32.mrf.mxu0  ;;  %v1495_v7 = vpop.f32.mrf.mxu1 }
 0x244   :  { %v1506_v8 = vsel %vm1505_vm2, %v1503_v2, -inf  ;;  %v1539_v60 = vsel %vm1538_vm12, %v1503_v2, -inf  ;;  %v1719_v9 = vsel %vm1718_vm13, %v1503_v2, -inf  ;;  %v1824_v10 = vsel %vm1823_vm14, %v1503_v2, -inf }
 0x245   :  { %v1507_v11 = vrot.slane %v1506_v8, 4  ;;  %v1540_v12 = vrot.slane %v1539_v60, 4  ;;  %v1720_v13 = vrot.slane %v1719_v9, 4  ;;  %v1825_v14 = vrot.slane %v1824_v10, 4  ;;  %v2531_v15 = vpop.f32.mrf.mxu0  ;;  %v2545_v16 = vpop.f32.mrf.mxu1 }
 0x246   :  { %v1500_v17 = vadd.f32 %v1414_v6, %v1314_v4  ;;  %v1502_v18 = vadd.f32 %v1495_v7, %v1316_v5 }
 0x247   :  { %v1508_v19 = vmax.f32 %v1506_v8, %v1507_v11  ;;  %v1541_v20 = vmax.f32 %v1539_v60, %v1540_v12  ;;  %v1721_v21 = vmax.f32 %v1719_v9, %v1720_v13  ;;  %v1826_v50 = vmax.f32 %v1824_v10, %v1825_v14 }
 0x248   :  { %v1504_v41 = vmax.f32 %v1500_v17, %v1502_v18 }
 0x249   :  { %v1509_v23 = vrot.slane %v1508_v19, 2  ;;  %v1542_v24 = vrot.slane %v1541_v20, 2  ;;  %v1722_v25 = vrot.slane %v1721_v21, 2  ;;  %v1827_v56 = vrot.slane %v1826_v50, 2 }
 0x24a   :  { %v1513_v26 = vsel %vm1505_vm2, %v1504_v41, -inf  ;;  %v1546_v28 = vsel %vm1538_vm12, %v1504_v41, -inf  ;;  %v1726_v29 = vsel %vm1718_vm13, %v1504_v41, -inf  ;;  %v1831_v30 = vsel %vm1823_vm14, %v1504_v41, -inf }
 0x24b   :  { %v1510_v31 = vmax.f32 %v1508_v19, %v1509_v23  ;;  %v1543_v32 = vmax.f32 %v1541_v20, %v1542_v24  ;;  %v1723_v39 = vmax.f32 %v1721_v21, %v1722_v25  ;;  %v1828_v42 = vmax.f32 %v1826_v50, %v1827_v56 }
 0x24c   :  { %v1514_v34 = vrot.slane %v1513_v26, 4  ;;  %v1547_v35 = vrot.slane %v1546_v28, 4  ;;  %v1727_v0 = vrot.slane %v1726_v29, 4  ;;  %v1832_v36 = vrot.slane %v1831_v30, 4 }
 0x24d   :  { %v1511_v38 = vrot.slane %v1510_v31, 1  ;;  %v1544_v37 = vrot.slane %v1543_v32, 1  ;;  %v1724_v40 = vrot.slane %v1723_v39, 1  ;;  %v1829_v43 = vrot.slane %v1828_v42, 1 }
 0x24e   :  { %v1515_v44 = vmax.f32 %v1513_v26, %v1514_v34  ;;  %v1548_v45 = vmax.f32 %v1546_v28, %v1547_v35  ;;  %v1728_v46 = vmax.f32 %v1726_v29, %v1727_v0  ;;  %v1833_v27 = vmax.f32 %v1831_v30, %v1832_v36 }
 0x24f   :  { %v1512_v47 = vmax.f32 %v1510_v31, %v1511_v38  ;;  %v1545_v49 = vmax.f32 %v1543_v32, %v1544_v37  ;;  %v1725_v51 = vmax.f32 %v1723_v39, %v1724_v40  ;;  %v1830_v52 = vmax.f32 %v1828_v42, %v1829_v43 }
 0x250   :  { %v1516_v53 = vrot.slane %v1515_v44, 2  ;;  %v1549_v54 = vrot.slane %v1548_v45, 2  ;;  %v1729_v48 = vrot.slane %v1728_v46, 2  ;;  %v1834_v55 = vrot.slane %v1833_v27, 2 }
 0x251   :  { %v1524_v63 = vadd.f32 %v1523_v22, %v1512_v47  ;;  %v1553_v1 = vadd.f32 %v1545_v49, %v1523_v22  ;;  %v1733_v2 = vadd.f32 %v1725_v51, %v1523_v22  ;;  %v1838_v3 = vadd.f32 %v1830_v52, %v1523_v22  ;;  %v2707_v51 = vld [vmem:[%s3452_s6 + $0x50] sm:$0xff]  }
 0x252   :  { %v1517_v57 = vmax.f32 %v1515_v44, %v1516_v53  ;;  %v1550_v58 = vmax.f32 %v1548_v45, %v1549_v54  ;;  %v1730_v59 = vmax.f32 %v1728_v46, %v1729_v48  ;;  %v1835_v62 = vmax.f32 %v1833_v27, %v1834_v55  ;;  %v2705_v44 = vld [vmem:[%s3452_s6 + $0x58] sm:$0xff]   ;;  %v2708_v52 = vld [vmem:[%s3452_s6 + $0x70] sm:$0xff]   ;;  %v2709_v53 = vld [vmem:[%s3452_s6 + $0x48] sm:$0xff]  }
 0x253   :  { %v1555_v11 = vmax.f32 %v1553_v1, 0.0  ;;  %v1526_v12 = vmax.f32 %v1524_v63, 0.0  ;;  %v1735_v13 = vmax.f32 %v1733_v2, 0.0  ;;  %v1840_v14 = vmax.f32 %v1838_v3, 0.0  ;;  %v2706_v45 = vld [vmem:[%s3452_s6 + $0x78] sm:$0xff]   ;;  %v2710_v54 = vld [vmem:[%s3452_s6 + $0x68] sm:$0xff]  }
 0x254   :  { %v1518_v4 = vrot.slane %v1517_v57, 1  ;;  %v1551_v5 = vrot.slane %v1550_v58, 1  ;;  %v1731_v6 = vrot.slane %v1730_v59, 1  ;;  %v1836_v7 = vrot.slane %v1835_v62, 1  ;;  %v2711_v48 = vld [vmem:[%s3452_s6 + $0x40] sm:$0xff]   ;;  %v2715_v63 = vld [vmem:[%s3453_s7 + $0x8] sm:$0xff]  }
 0x255   :  { %v1566_v41 = vpack.c.bf16 %v1555_v11, %v1555_v11  ;;  %v1536_v23 = vpack.c.bf16 %v1526_v12, %v1526_v12  ;;  %v1746_v24 = vpack.c.bf16 %v1735_v13, %v1735_v13  ;;  %v1851_v25 = vpack.c.bf16 %v1840_v14, %v1840_v14  ;;  %v2712_v55 = vld [vmem:[%s3452_s6 + $0x60] sm:$0xff]   ;;  %v2717_v1 = vld [vmem:[%s3454_s8 + $0x8] sm:$0xff]  }
 0x256   :  { %v1519_v8 = vmax.f32 %v1517_v57, %v1518_v4  ;;  %v1552_v60 = vmax.f32 %v1550_v58, %v1551_v5  ;;  %v1732_v9 = vmax.f32 %v1730_v59, %v1731_v6  ;;  %v1837_v10 = vmax.f32 %v1835_v62, %v1836_v7  ;;  %v2713_v59 = vld [vmem:[%s3453_s7 + $0x18] sm:$0xff]   ;;  %v2714_v62 = vld [vmem:[%s3453_s7 + $0x10] sm:$0xff]   ;;  %v2716_v2 = vld [vmem:[%s3453_s7] sm:$0xff]  }
 0x257   :  { %v1570_v42 = vunpack.c.l.b16 %v1566_v41  ;;  %v1646_v34 = vunpack.c.l.b16 %v1536_v23  ;;  %v1855_v35 = vunpack.c.l.b16 %v1851_v25  ;;  %v2718_v25 = vld [vmem:[%s3454_s8] sm:$0xff]  }
 0x258   :  { %v1525_v15 = vadd.f32 %v1523_v22, %v1519_v8  ;;  %v1554_v16 = vadd.f32 %v1552_v60, %v1523_v22  ;;  %v1734_v17 = vadd.f32 %v1732_v9, %v1523_v22  ;;  %v1839_v18 = vadd.f32 %v1837_v10, %v1523_v22 }
 0x259   :  { %v1750_v22 = vunpack.c.l.b16 %v1746_v24  ;;  %v1930_v10 = vsub.s32 2, %v3018_v61 }
 0x25a   :  { %v1527_v19 = vmax.f32 %v1525_v15, 0.0  ;;  %v1556_v20 = vmax.f32 %v1554_v16, 0.0  ;;  %v1736_v21 = vmax.f32 %v1734_v17, 0.0  ;;  %v1841_v50 = vmax.f32 %v1839_v18, 0.0  ;;  %v2719_v15 = vld [vmem:[%s3455_s9] sm:$0x1f] }
 0x25b   :  { %s2746_s9 = smov [#allocation2]  }
 0x25c   :  { %v1567_v56 = vpack.c.bf16 %v1556_v20, %v1556_v20  ;;  %v1537_v26 = vpack.c.bf16 %v1527_v19, %v1527_v19  ;;  %v1747_v28 = vpack.c.bf16 %v1736_v21, %v1736_v21  ;;  %v1852_v29 = vpack.c.bf16 %v1841_v50, %v1841_v50  ;;  %s2087_s16 = sshll.u32 %s2746_s9, 4  ;;  %s2088_s16 = int_to_ptr.vmem [resolvable:$true] %s2087_s16 }
 0x25d   :  { %s2720_s8 = scalar_lea.vmem %s2088_s16, 32  ;;  %p2725_p1 = scmp.lt.s32.totalorder %s2088_s16, %s2088_s16 }
 0x25e   :  { %v1571_v30 = vunpack.c.l.b16 %v1567_v56  ;;  %v1647_v31 = vunpack.c.l.b16 %v1537_v26  ;;  %v1751_v32 = vunpack.c.l.b16 %v1747_v28  ;;  %v1856_v39 = vunpack.c.l.b16 %v1852_v29  ;;  %p2721_p0 = scmp.ne.s32.totalorder %s2088_s16, %s2720_s8  ;;  %p2726_p2 = scmp.lt.s32.totalorder %s2720_s8, %s2720_s8 }
 0x25f   :  { %v1945_v56 = vsub.s32 3, %v3018_v61 }
 0x260   :  { %v1572_v0 = vrot.slane %v1571_v30, 7  ;;  %v1648_v36 = vrot.slane %v1647_v31, 7  ;;  %v1752_v38 = vrot.slane %v1751_v32, 7  ;;  %v1857_v37 = vrot.slane %v1856_v39, 7  ;;  %p2727_p3 = por %p2726_p2, %p2725_p1 }
 0x261   :  { %v1946_v26 = vrot.slane %v2719_v15, %v1945_v56 }
 0x262   :  { %v1574_v40 = vsel %vm1573_vm15, %v1572_v0, %v1570_v42  ;;  %v1649_v43 = vsel %vm1573_vm15, %v1648_v36, %v1646_v34  ;;  %v1753_v46 = vsel %vm1573_vm15, %v1752_v38, %v1750_v22  ;;  %v1858_v27 = vsel %vm1573_vm15, %v1857_v37, %v1855_v35  ;;  %p2728_p4 = pnand %p2727_p3, %p2721_p0 }
 0x263   :  { %v1575_v47 = vpack.c.b16 %v1574_v40, %v1574_v40  ;;  %v1650_v49 = vpack.c.b16 %v1649_v43, %v1649_v43  ;;  %v1754_v57 = vpack.c.b16 %v1753_v46, %v1753_v46  ;;  %v1859_v58 = vpack.c.b16 %v1858_v27, %v1858_v27 }
 0x264   :  { %v2022_v34 = vsub.s32 4, %v3018_v61 }
 0x265   :  { %2555 = vmatmul.mubr.msk.bf16.vlgmr.msra.gmra.mxu0 %vm1600_vm0, %v1575_v47  ;;  %2567 = vmatmul.mubr.msk.bf16.vlgmr.msra.gmra.mxu1 %vm1600_vm0, %v1650_v49 }
 0x266   :  { %2571 = vmatpush3.bf16.msra.mxu0 %v2705_v44  ;;  %2583 = vmatpush3.bf16.msra.mxu1 %v2706_v45  ;;  %v2023_v22 = vrot.slane %v2719_v15, %v2022_v34 }
 0x267   :  { %2572 = vmatprep.subr.bf16.mxu0 %v2743_v33  ;;  %2584 = vmatprep.subr.bf16.mxu1 %v2743_v33 }
 0x268   :  { %2578 = vmatprep.mubr.msk.bf16.mxu0 %vm2744_vm3, %v2743_v33  ;;  %2590 = vmatprep.mubr.msk.bf16.mxu1 %vm2744_vm3, %v2743_v33 }
 0x26a   :  { %2573 = vmatpush3.bf16.msra.mxu0 %v2707_v51  ;;  %2585 = vmatpush3.bf16.msra.mxu1 %v2708_v52 }
 0x26b   :  { %2574 = vmatprep.subr.bf16.mxu0 %v2743_v33  ;;  %2586 = vmatprep.subr.bf16.mxu1 %v2743_v33 }
 0x26e   :  { %2575 = vmatpush3.bf16.msra.mxu0 %v2709_v53  ;;  %2587 = vmatpush3.bf16.msra.mxu1 %v2710_v54 }
 0x26f   :  { %2576 = vmatprep.subr.bf16.mxu0 %v2743_v33  ;;  %2588 = vmatprep.subr.bf16.mxu1 %v2743_v33 }
 0x272   :  { %2577 = vmatpush3.bf16.msra.mxu0 %v2711_v48  ;;  %2589 = vmatpush3.bf16.msra.mxu1 %v2712_v55 }
 0x273   :  { %2594 = vmatprep.subr.bf16.mxu0 %v2743_v33  ;;  %2606 = vmatprep.subr.bf16.mxu1 %v2743_v33 }
 0x275   :  { %2579 = vmatmul.mubr.msk.bf16.vlgmr.msra.gmra.mxu0 %vm1600_vm0, %v1754_v57  ;;  %2591 = vmatmul.mubr.msk.bf16.vlgmr.msra.gmra.mxu1 %vm1600_vm0, %v1859_v58 }
 0x276   :  { %2602 = vmatprep.mubr.msk.bf16.mxu0 %vm2744_vm3, %v2743_v33  ;;  %2610 = vmatprep.mubr.msk.bf16.mxu1 %vm2744_vm3, %v2743_v33  ;;  %vm2036_vm3 = vcmask 261120  }
 0x277   :  { %2595 = vmatpush3.bf16.msra.mxu0 %v2713_v59  ;;  %2607 = vmatpush3.bf16.msra.mxu1 %v2717_v1 }
 0x278   :  { %2596 = vmatprep.subr.bf16.mxu0 %v2743_v33  ;;  %2608 = vmatprep.subr.bf16.mxu1 %v2743_v33 }
 0x27b   :  { %2597 = vmatpush3.bf16.msra.mxu0 %v2714_v62  ;;  %2609 = vmatpush3.bf16.msra.mxu1 %v2718_v25 }
 0x27c   :  { %2598 = vmatprep.subr.bf16.mxu0 %v2743_v33 }
 0x27f   :  { %2599 = vmatpush3.bf16.msra.mxu0 %v2715_v63 }
 0x280   :  { %2600 = vmatprep.subr.bf16.mxu0 %v2743_v33  ;;  %v1931_v33 = vrot.slane %v2719_v15, %v1930_v10 }
 0x283   :  { %2601 = vmatpush3.bf16.msra.mxu0 %v2716_v2 }
 0x325   :  { %v1638_v3 = vpop.f32.mrf.mxu0  ;;  %v1712_v4 = vpop.f32.mrf.mxu1 }
 0x326   :  { %v1713_v11 = vadd.f32 %v1712_v4, %v1638_v3 }
 0x327   :  { %v2556_v5 = vpop.f32.mrf.mxu0  ;;  %v2568_v6 = vpop.f32.mrf.mxu1 }
 0x329   :  { %v1641_v7 = vpop.f32.mrf.mxu0  ;;  %v1715_v8 = vpop.f32.mrf.mxu1 }
 0x32b   :  { %v2557_v60 = vpop.f32.mrf.mxu0  ;;  %v2569_v9 = vpop.f32.mrf.mxu1 }
 0x335   :  { %v1816_v12 = vpop.f32.mrf.mxu0  ;;  %v1921_v13 = vpop.f32.mrf.mxu1 }
 0x336   :  { %v1822_v14 = vadd.f32 %v1816_v12, %v1713_v11 }
 0x337   :  { %v2580_v16 = vpop.f32.mrf.mxu0  ;;  %v2592_v17 = vpop.f32.mrf.mxu1 }
 0x338   :  { %v1927_v18 = vadd.f32 %v1921_v13, %v1822_v14 }
 0x339   :  { %v1819_v19 = vpop.f32.mrf.mxu0  ;;  %v1924_v20 = vpop.f32.mrf.mxu1 }
 0x33a   :  { %v1932_v21 = vadd.f32 %v1931_v33, %v1927_v18 }
 0x33b   :  { %v2581_v50 = vpop.f32.mrf.mxu0  ;;  %v2593_v41 = vpop.f32.mrf.mxu1 }
 0x33c   :  { %v1933_v23 = vmax.f32 %v1932_v21, 0.0 }
 0x33e   :  { %v1942_v24 = vpack.c.bf16 %v1933_v23, %v1933_v23 }
 0x340   :  { %2603 = vmatmul.mubr.msk.bf16.vlgmr.msra.gmra.mxu0 %vm1600_vm0, %v1942_v24 }
 0x400   :  { %v2008_v28 = vpop.f32.mrf.mxu0 }
 0x401   :  { %v2009_v29 = vadd.f32 %v2008_v28, %v1946_v26 }
 0x402   :  { %v2604_v30 = vpop.f32.mrf.mxu0 }
 0x403   :  { %v2014_v31 = vmax.f32 %v2009_v29, 0.0 }
 0x404   :  { %v2011_v32 = vpop.f32.mrf.mxu0 }
 0x405   :  { %v2019_v39 = vpack.c.bf16 %v2014_v31, %v2014_v31 }
 0x406   :  { %v2605_v42 = vpop.f32.mrf.mxu0 }
 0x407   :  { %2611 = vmatmul.mubr.msk.bf16.vlgmr.msra.gmra.mxu1 %vm2036_vm3, %v2019_v39 }
 0x4c7   :  { %v2074_v35 = vpop.f32.mrf.mxu1 }
 0x4c8   :  { %v2075_v0 = vadd.f32 %v2074_v35, %v2023_v22 }
 0x4c9   :  { %v2612_v36 = vpop.f32.mrf.mxu1 }
 0x4ca   :  { %2080 = vst [vmem:[#allocation2] sm:$0x3] %v2075_v0 }
 0x4cb   :  { %v2077_v38 = vpop.f32.mrf.mxu1 }
 0x4cc   :  { %2731 = shalt.err (!%p2728_p4)
}
 0x4cd   :  { %2090 = dma.vmem_to_hbm [thread:$0]  %s2088_s16, 32, %s3456_s10, [#allocation3]   ;;  %v2613_v61 = vpop.f32.mrf.mxu1 }
 0x4ce   :  { %2740 = dma.done.wait [#allocation3], 32  }
 0x4cf   :  { %2741 = vsyncadd [#allocation3], 4294967264 }
 0x4d0   :  { %2094 = vsyncpa [#allocation3], 1 }

</bundles_post_ra>
